<compile_context>
chip_gen: v5e
topology: v5e:2x2
jax: 0.10.0
libtpu: 0.0.40
codegen_flags: <defaults>
</compile_context>

<pallas_src>
import math

import jax
import jax.numpy as jnp
from jax.experimental import pallas as pl
from jax.experimental.pallas import tpu as pltpu


# ---------------------------------------------------------------------------
# Fused (bf16 matmul + scale/shift + activation) Pallas kernel
# ---------------------------------------------------------------------------
def fused_matmul(x, w, scale, shift, act="none", alpha=0.25, tm=1024):
    """Computes act((x @ w) * scale + shift) with a Pallas TPU kernel.

    x: (M, K), w: (K, N); both are cast to bf16 and accumulated in f32.
    scale/shift: (N,) f32 (conv bias must already be folded into `shift`).
    act: "none" | "relu" | "prelu" ; alpha is a Python float (PReLU init).
    """
    M, K = x.shape
    K2, N = w.shape
    assert K == K2

    tm = min(tm, M)                 # either full M or a multiple of 8 (1024)
    grid = pl.cdiv(M, tm)           # ragged last block handled by Pallas

    x_bf = x.astype(jnp.bfloat16)
    w_bf = w.astype(jnp.bfloat16)
    scale2 = scale.reshape(1, N).astype(jnp.float32)
    shift2 = shift.reshape(1, N).astype(jnp.float32)

    def kernel(x_ref, w_ref, s_ref, t_ref, o_ref):
        y = jnp.dot(x_ref[...], w_ref[...],
                    preferred_element_type=jnp.float32)
        y = y * s_ref[...] + t_ref[...]
        if act == "relu":
            y = jnp.maximum(y, 0.0)
        elif act == "prelu":
            y = jnp.where(y > 0.0, y, alpha * y)
        o_ref[...] = y.astype(o_ref.dtype)

    cost = pl.CostEstimate(
        flops=2 * M * K * N,
        transcendentals=0,
        bytes_accessed=2 * M * K + 2 * K * N + 4 * M * N + 8 * N)

    out = pl.pallas_call(
        kernel,
        out_shape=jax.ShapeDtypeStruct((M, N), jnp.float32),
        grid=(grid,),
        in_specs=[
            pl.BlockSpec((tm, K), lambda i: (i, 0)),
            pl.BlockSpec((K, N), lambda i: (0, 0)),
            pl.BlockSpec((1, N), lambda i: (0, 0)),
            pl.BlockSpec((1, N), lambda i: (0, 0)),
        ],
        out_specs=pl.BlockSpec((tm, N), lambda i: (i, 0)),
        compiler_params=pltpu.CompilerParams(
            dimension_semantics=("parallel",)),
        cost_estimate=cost,
    )(x_bf, w_bf, scale2, shift2)
    return out


# ---------------------------------------------------------------------------
# ConvTranspose2d(k=2, s=2, p=0) == GEMM + pixel-shuffle (no output overlap)
# ---------------------------------------------------------------------------
def conv_transpose_2x2_fused(x, w, b, scale, shift, act, alpha=0.25):
    """x: (B, H, W, Cin) NHWC.  w: (Cin, Cout, 2, 2) PyTorch ConvTranspose2d
    layout.  Returns (B, 2H, 2W, Cout) NHWC with bias + BN(eval) + activation
    fused into the matmul epilogue."""
    B, H, W, Cin = x.shape
    Cout = w.shape[1]
    M, N = B * H * W, Cout * 4

    wm = w.reshape(Cin, N)                      # columns ordered (cout, kh, kw)
    s_exp = jnp.repeat(scale.astype(jnp.float32), 4)
    # fold conv bias into the BN shift:  (xW + b)*s + t == (xW)*s + (b*s + t)
    t_exp = jnp.repeat((b * scale + shift).astype(jnp.float32), 4)

    y = fused_matmul(x.reshape(M, Cin), wm, s_exp, t_exp, act=act, alpha=alpha)

    # pixel-shuffle: (B, H, W, Cout, kh, kw) -> (B, 2H, 2W, Cout), stays NHWC
    y = y.reshape(B, H, W, Cout, 2, 2)
    y = y.transpose(0, 1, 4, 2, 5, 3).reshape(B, 2 * H, 2 * W, Cout)
    return y


# ---------------------------------------------------------------------------
# Converter: 4 x (Linear -> ReLU) fused into a single Pallas call
# ---------------------------------------------------------------------------
def converter_fused(x, weights, biases):
    """x: (B, 30).  weights[i]: (in_i, out_i), biases[i]: (out_i,).
    All weights (~3 MB f32) are VMEM-resident; one launch for the whole stack.
    Dropout(0.2) between layers is identity in eval mode."""
    B = x.shape[0]
    Nout = weights[-1].shape[1]

    def kernel(x_ref, w1, b1, w2, b2, w3, b3, w4, b4, o_ref):
        h = x_ref[...]
        for w_ref, b_ref in ((w1, b1), (w2, b2), (w3, b3), (w4, b4)):
            h = jnp.dot(h, w_ref[...], preferred_element_type=jnp.float32)
            h = jnp.maximum(h + b_ref[...], 0.0)
        o_ref[...] = h.astype(o_ref.dtype)

    in_specs = [pl.BlockSpec(x.shape, lambda i: (0, 0))]
    args = [x.astype(jnp.float32)]
    for w, b in zip(weights, biases):
        in_specs.append(pl.BlockSpec(w.shape, lambda i: (0, 0)))
        in_specs.append(pl.BlockSpec((1, w.shape[1]), lambda i: (0, 0)))
        args.append(w.astype(jnp.float32))
        args.append(b.reshape(1, -1).astype(jnp.float32))

    return pl.pallas_call(
        kernel,
        out_shape=jax.ShapeDtypeStruct((B, Nout), jnp.float32),
        grid=(1,),
        in_specs=in_specs,
        out_specs=pl.BlockSpec((B, Nout), lambda i: (0, 0)),
    )(*args)


# ---------------------------------------------------------------------------
# Deterministic parameter init (shapes from LinConv_4.__init__)
# ---------------------------------------------------------------------------
def init_params(key):
    ks = jax.random.split(key, 32)
    p = {}

    def lin(i, fin, fout):
        w = jax.random.normal(ks[i], (fout, fin), jnp.float32) / math.sqrt(fin)
        b = jax.random.normal(ks[i + 1], (fout,), jnp.float32) * 0.01
        return w, b

    p["l1_w"], p["l1_b"] = lin(0, 30, 100)
    p["l2_w"], p["l2_b"] = lin(2, 100, 400)
    p["l3_w"], p["l3_b"] = lin(4, 400, 600)
    p["l4_w"], p["l4_b"] = lin(6, 600, 800)          # 800 == 50*4*4

    def convt(i, cin, cout, k):
        w = jax.random.normal(ks[i], (cin, cout, k, k), jnp.float32) / math.sqrt(cin * k * k)
        b = jax.random.normal(ks[i + 1], (cout,), jnp.float32) * 0.01
        return w, b

    p["c1_w"], p["c1_b"] = convt(8, 50, 20, 2)
    p["c2_w"], p["c2_b"] = convt(10, 20, 10, 2)
    p["c3_w"], p["c3_b"] = convt(12, 10, 5, 2)
    p["c4_w"], p["c4_b"] = convt(14, 5, 3, 2)

    def bn(i, c):
        gamma = 0.5 + jax.random.uniform(ks[i], (c,), jnp.float32)
        beta = jax.random.normal(ks[i + 1], (c,), jnp.float32) * 0.1
        rmean = jax.random.normal(ks[i + 2], (c,), jnp.float32) * 0.1
        rvar = 0.5 + jax.random.uniform(ks[i + 3], (c,), jnp.float32)
        eps = 1e-5
        scale = gamma / jnp.sqrt(rvar + eps)
        shift = beta - rmean * scale
        return scale, shift

    p["bn1_s"], p["bn1_t"] = bn(16, 20)
    p["bn2_s"], p["bn2_t"] = bn(20, 10)
    p["bn3_s"], p["bn3_t"] = bn(24, 5)

    # PReLU single-alpha, PyTorch default init 0.25 (kept as Python floats so
    # they fold into the kernel as compile-time constants).
    p["prelu1_a"] = 0.25
    p["prelu2_a"] = 0.25
    return p


# ---------------------------------------------------------------------------
# Full forward pass (eval mode)
# ---------------------------------------------------------------------------
def lin_conv_forward(x, p):
    B = x.shape[0]
    h = x.reshape(B, 5 * 6).astype(jnp.float32)

    # converter: Linear(30,100)/ReLU -> Linear(100,400)/ReLU
    #            -> Linear(400,600)/ReLU -> Linear(600,800)/ReLU  (one launch)
    h = converter_fused(
        h,
        [p["l1_w"].T, p["l2_w"].T, p["l3_w"].T, p["l4_w"].T],
        [p["l1_b"], p["l2_b"], p["l3_b"], p["l4_b"]],
    )

    # (B, 800) -> (B, 50, 4, 4) NCHW -> NHWC; stay NHWC through the decoder
    h = h.reshape(B, 50, 4, 4).transpose(0, 2, 3, 1)

    ones = lambda n: jnp.ones((n,), jnp.float32)
    zeros = lambda n: jnp.zeros((n,), jnp.float32)

    h = conv_transpose_2x2_fused(h, p["c1_w"], p["c1_b"], p["bn1_s"], p["bn1_t"], "relu")
    h = conv_transpose_2x2_fused(h, p["c2_w"], p["c2_b"], p["bn2_s"], p["bn2_t"], "relu")
    h = conv_transpose_2x2_fused(h, p["c3_w"], p["c3_b"], p["bn3_s"], p["bn3_t"],
                                 "prelu", alpha=p["prelu1_a"])
    h = conv_transpose_2x2_fused(h, p["c4_w"], p["c4_b"], ones(3), zeros(3),
                                 "prelu", alpha=p["prelu2_a"])

    # NHWC -> NCHW, final view (B, 3, 64, 64)
    return h.transpose(0, 3, 1, 2).reshape(B, 3, 64, 64)


if __name__ == "__main__":
    key = jax.random.PRNGKey(0)
    pkey, xkey = jax.random.split(key)
    params = init_params(pkey)

    # input reshapeable to (B, 5*6); use (2, 5, 6)
    x = jax.random.normal(xkey, (2, 5, 6), jnp.float32)

    out = lin_conv_forward(x, params)
    out = jax.block_until_ready(out)

    assert out.shape == (2, 3, 64, 64), out.shape
    assert bool(jnp.all(jnp.isfinite(out)))
    print("KERNEL_OK")
</pallas_src>

<mosaic_0001>
module attributes {stable_mosaic.version = 11 : i64} {
  func.func @kernel(%arg0: i32, %arg1: memref<2x30xf32, #tpu.memory_space<vmem>>, %arg2: memref<30x100xf32, #tpu.memory_space<vmem>>, %arg3: memref<1x100xf32, #tpu.memory_space<vmem>>, %arg4: memref<100x400xf32, #tpu.memory_space<vmem>>, %arg5: memref<1x400xf32, #tpu.memory_space<vmem>>, %arg6: memref<400x600xf32, #tpu.memory_space<vmem>>, %arg7: memref<1x600xf32, #tpu.memory_space<vmem>>, %arg8: memref<600x800xf32, #tpu.memory_space<vmem>>, %arg9: memref<1x800xf32, #tpu.memory_space<vmem>>, %arg10: memref<2x800xf32, #tpu.memory_space<vmem>>) attributes {dimension_semantics = [#tpu.dimension_semantics<arbitrary>], iteration_bounds = array<i64: 1>, scalar_prefetch = 0 : i64, scratch_operands = 0 : i64, tpu.core_type = #tpu.core_type<tc>, window_params = [{pipeline_mode = #tpu.pipeline_mode<synchronous>, transform_indices = @transform_0, window_bounds = array<i64: 2, 30>}, {pipeline_mode = #tpu.pipeline_mode<synchronous>, transform_indices = @transform_1, window_bounds = array<i64: 30, 100>}, {pipeline_mode = #tpu.pipeline_mode<synchronous>, transform_indices = @transform_2, window_bounds = array<i64: 1, 100>}, {pipeline_mode = #tpu.pipeline_mode<synchronous>, transform_indices = @transform_3, window_bounds = array<i64: 100, 400>}, {pipeline_mode = #tpu.pipeline_mode<synchronous>, transform_indices = @transform_4, window_bounds = array<i64: 1, 400>}, {pipeline_mode = #tpu.pipeline_mode<synchronous>, transform_indices = @transform_5, window_bounds = array<i64: 400, 600>}, {pipeline_mode = #tpu.pipeline_mode<synchronous>, transform_indices = @transform_6, window_bounds = array<i64: 1, 600>}, {pipeline_mode = #tpu.pipeline_mode<synchronous>, transform_indices = @transform_7, window_bounds = array<i64: 600, 800>}, {pipeline_mode = #tpu.pipeline_mode<synchronous>, transform_indices = @transform_8, window_bounds = array<i64: 1, 800>}, {pipeline_mode = #tpu.pipeline_mode<synchronous>, transform_indices = @transform_9, window_bounds = array<i64: 2, 800>}]} {
    %c0 = arith.constant 0 : index
    %c0_0 = arith.constant 0 : index
    %0 = vector.load %arg1[%c0, %c0_0] : memref<2x30xf32, #tpu.memory_space<vmem>>, vector<2x30xf32>
    %c0_1 = arith.constant 0 : index
    %c0_2 = arith.constant 0 : index
    %1 = vector.load %arg2[%c0_1, %c0_2] : memref<30x100xf32, #tpu.memory_space<vmem>>, vector<30x100xf32>
    %cst = arith.constant dense<0.000000e+00> : vector<2x100xf32>
    %2 = tpu.matmul %0, %1, %cst {dimension_numbers = #tpu.dot_dimension_numbers<[1], [0], [0], [1], [0, 0, 1, 1], [], []>} : vector<2x30xf32>, vector<30x100xf32>, vector<2x100xf32> -> vector<2x100xf32>
    %c0_3 = arith.constant 0 : index
    %c0_4 = arith.constant 0 : index
    %3 = vector.load %arg3[%c0_3, %c0_4] : memref<1x100xf32, #tpu.memory_space<vmem>>, vector<1x100xf32>
    %4 = vector.broadcast %3 : vector<1x100xf32> to vector<2x100xf32>
    %5 = arith.addf %2, %4 : vector<2x100xf32>
    %cst_5 = arith.constant 0.000000e+00 : f32
    %6 = vector.broadcast %cst_5 : f32 to vector<2x100xf32>
    %7 = arith.maximumf %5, %6 : vector<2x100xf32>
    %c0_6 = arith.constant 0 : index
    %c0_7 = arith.constant 0 : index
    %8 = vector.load %arg4[%c0_6, %c0_7] : memref<100x400xf32, #tpu.memory_space<vmem>>, vector<100x400xf32>
    %cst_8 = arith.constant dense<0.000000e+00> : vector<2x400xf32>
    %9 = tpu.matmul %7, %8, %cst_8 {dimension_numbers = #tpu.dot_dimension_numbers<[1], [0], [0], [1], [0, 0, 1, 1], [], []>} : vector<2x100xf32>, vector<100x400xf32>, vector<2x400xf32> -> vector<2x400xf32>
    %c0_9 = arith.constant 0 : index
    %c0_10 = arith.constant 0 : index
    %10 = vector.load %arg5[%c0_9, %c0_10] : memref<1x400xf32, #tpu.memory_space<vmem>>, vector<1x400xf32>
    %11 = vector.broadcast %10 : vector<1x400xf32> to vector<2x400xf32>
    %12 = arith.addf %9, %11 : vector<2x400xf32>
    %cst_11 = arith.constant 0.000000e+00 : f32
    %13 = vector.broadcast %cst_11 : f32 to vector<2x400xf32>
    %14 = arith.maximumf %12, %13 : vector<2x400xf32>
    %c0_12 = arith.constant 0 : index
    %c0_13 = arith.constant 0 : index
    %15 = vector.load %arg6[%c0_12, %c0_13] : memref<400x600xf32, #tpu.memory_space<vmem>>, vector<400x600xf32>
    %cst_14 = arith.constant dense<0.000000e+00> : vector<2x600xf32>
    %16 = tpu.matmul %14, %15, %cst_14 {dimension_numbers = #tpu.dot_dimension_numbers<[1], [0], [0], [1], [0, 0, 1, 1], [], []>} : vector<2x400xf32>, vector<400x600xf32>, vector<2x600xf32> -> vector<2x600xf32>
    %c0_15 = arith.constant 0 : index
    %c0_16 = arith.constant 0 : index
    %17 = vector.load %arg7[%c0_15, %c0_16] : memref<1x600xf32, #tpu.memory_space<vmem>>, vector<1x600xf32>
    %18 = vector.broadcast %17 : vector<1x600xf32> to vector<2x600xf32>
    %19 = arith.addf %16, %18 : vector<2x600xf32>
    %cst_17 = arith.constant 0.000000e+00 : f32
    %20 = vector.broadcast %cst_17 : f32 to vector<2x600xf32>
    %21 = arith.maximumf %19, %20 : vector<2x600xf32>
    %c0_18 = arith.constant 0 : index
    %c0_19 = arith.constant 0 : index
    %22 = vector.load %arg8[%c0_18, %c0_19] : memref<600x800xf32, #tpu.memory_space<vmem>>, vector<600x800xf32>
    %cst_20 = arith.constant dense<0.000000e+00> : vector<2x800xf32>
    %23 = tpu.matmul %21, %22, %cst_20 {dimension_numbers = #tpu.dot_dimension_numbers<[1], [0], [0], [1], [0, 0, 1, 1], [], []>} : vector<2x600xf32>, vector<600x800xf32>, vector<2x800xf32> -> vector<2x800xf32>
    %c0_21 = arith.constant 0 : index
    %c0_22 = arith.constant 0 : index
    %24 = vector.load %arg9[%c0_21, %c0_22] : memref<1x800xf32, #tpu.memory_space<vmem>>, vector<1x800xf32>
    %25 = vector.broadcast %24 : vector<1x800xf32> to vector<2x800xf32>
    %26 = arith.addf %23, %25 : vector<2x800xf32>
    %cst_23 = arith.constant 0.000000e+00 : f32
    %27 = vector.broadcast %cst_23 : f32 to vector<2x800xf32>
    %28 = arith.maximumf %26, %27 : vector<2x800xf32>
    %c0_24 = arith.constant 0 : index
    %c0_25 = arith.constant 0 : index
    %29 = vector.load %arg10[%c0_24, %c0_25] : memref<2x800xf32, #tpu.memory_space<vmem>>, vector<2x800xf32>
    tpu.vector_store %arg10[%c0_24, %c0_25], %28 {strides = array<i32>} : memref<2x800xf32, #tpu.memory_space<vmem>>, vector<2x800xf32>,
    return
  }
  func.func @transform_0(%arg0: i32) -> (i32, i32) {
    %c0_i32 = arith.constant 0 : i32
    %c0_i32_0 = arith.constant 0 : i32
    %c0_i32_1 = arith.constant 0 : i32
    return %c0_i32, %c0_i32_0 : i32, i32
  }
  func.func @transform_1(%arg0: i32) -> (i32, i32) {
    %c0_i32 = arith.constant 0 : i32
    %c0_i32_0 = arith.constant 0 : i32
    %c0_i32_1 = arith.constant 0 : i32
    return %c0_i32, %c0_i32_0 : i32, i32
  }
  func.func @transform_2(%arg0: i32) -> (i32, i32) {
    %c0_i32 = arith.constant 0 : i32
    %c0_i32_0 = arith.constant 0 : i32
    %c0_i32_1 = arith.constant 0 : i32
    return %c0_i32, %c0_i32_0 : i32, i32
  }
  func.func @transform_3(%arg0: i32) -> (i32, i32) {
    %c0_i32 = arith.constant 0 : i32
    %c0_i32_0 = arith.constant 0 : i32
    %c0_i32_1 = arith.constant 0 : i32
    return %c0_i32, %c0_i32_0 : i32, i32
  }
  func.func @transform_4(%arg0: i32) -> (i32, i32) {
    %c0_i32 = arith.constant 0 : i32
    %c0_i32_0 = arith.constant 0 : i32
    %c0_i32_1 = arith.constant 0 : i32
    return %c0_i32, %c0_i32_0 : i32, i32
  }
  func.func @transform_5(%arg0: i32) -> (i32, i32) {
    %c0_i32 = arith.constant 0 : i32
    %c0_i32_0 = arith.constant 0 : i32
    %c0_i32_1 = arith.constant 0 : i32
    return %c0_i32, %c0_i32_0 : i32, i32
  }
  func.func @transform_6(%arg0: i32) -> (i32, i32) {
    %c0_i32 = arith.constant 0 : i32
    %c0_i32_0 = arith.constant 0 : i32
    %c0_i32_1 = arith.constant 0 : i32
    return %c0_i32, %c0_i32_0 : i32, i32
  }
  func.func @transform_7(%arg0: i32) -> (i32, i32) {
    %c0_i32 = arith.constant 0 : i32
    %c0_i32_0 = arith.constant 0 : i32
    %c0_i32_1 = arith.constant 0 : i32
    return %c0_i32, %c0_i32_0 : i32, i32
  }
  func.func @transform_8(%arg0: i32) -> (i32, i32) {
    %c0_i32 = arith.constant 0 : i32
    %c0_i32_0 = arith.constant 0 : i32
    %c0_i32_1 = arith.constant 0 : i32
    return %c0_i32, %c0_i32_0 : i32, i32
  }
  func.func @transform_9(%arg0: i32) -> (i32, i32) {
    %c0_i32 = arith.constant 0 : i32
    %c0_i32_0 = arith.constant 0 : i32
    %c0_i32_1 = arith.constant 0 : i32
    return %c0_i32, %c0_i32_0 : i32, i32
  }
}

</mosaic_0001>

<bundles_post_ra>
// kernel: tpu_custom_call.1
= control target key start
LH: loop header
LB: loop body
LE: loop exit
PB: predicated region body
PF: predicated region fallthrough
CT: control target
= control target key end

     0   :  { %vm46_vm0 = vcmask 1045504   ;;  %vm137_vm1 = vcmask 1043456   ;;  %vm42_vm2 = vcmask 244736   ;;  %s4934_s0 = inlined_call_operand.vmem [shape: f32[2,30], index: 0, kind: input, shape index: {}]   ;;  %s4935_s1 = inlined_call_operand.vmem [shape: f32[30,100], index: 1, kind: input, shape index: {}]   ;;  %s4936_s2 = inlined_call_operand.vmem [shape: f32[1,100], index: 2, kind: input, shape index: {}]   ;;  %s4937_s3 = inlined_call_operand.vmem [shape: f32[100,400], index: 3, kind: input, shape index: {}]   ;;  %s4938_s4 = inlined_call_operand.vmem [shape: f32[1,400], index: 4, kind: input, shape index: {}]   ;;  %s4939_s5 = inlined_call_operand.vmem [shape: f32[400,600], index: 5, kind: input, shape index: {}]   ;;  %s4940_s6 = inlined_call_operand.vmem [shape: f32[1,600], index: 6, kind: input, shape index: {}]   ;;  %s4941_s7 = inlined_call_operand.vmem [shape: f32[600,800], index: 7, kind: input, shape index: {}]   ;;  %s4942_s8 = inlined_call_operand.vmem [shape: f32[1,800], index: 8, kind: input, shape index: {}]   ;;  %s4943_s9 = inlined_call_operand.hbm [shape: f32[2,800], index: 9, kind: output, shape index: {}]  }
   0x1   :  { %v37_v0 = vld [vmem:[%s4935_s1 + $0x18] sm:$0x3f]  ;;  %v36_v1 = vld [vmem:[%s4935_s1 + $0x10] sm:$0xff]  ;;  %v119_v2 = vld [vmem:[%s4937_s3 + $0x180] sm:$0xf] }
   0x2   :  { %2200 = vmatpush.msk.msra.mxu0 %vm46_vm0, %v37_v0  ;;  %v35_v3 = vld [vmem:[%s4935_s1 + $0x8] sm:$0xff]  ;;  %2202 = vmatpush.msk.msra.mxu1 %vm137_vm1, %v119_v2  ;;  %v121_v5 = vld [vmem:[%s4937_s3 + $0x190] sm:$0xf]  ;;  %v115_v6 = vld [vmem:[%s4937_s3 + $0x160] sm:$0xff] }
   0x3   :  { %v120_v4 = vld [vmem:[%s4937_s3 + $0x188] sm:$0xf]  ;;  %v117_v8 = vld [vmem:[%s4937_s3 + $0x170] sm:$0xff]  ;;  %v34_v9 = vld [vmem:[%s4935_s1] sm:$0xff]  ;;  %2206 = vmatpush.msk.msra.mxu3 %vm137_vm1, %v121_v5 }
   0x4   :  { %63 = vmatpush.msra.mxu0 %v36_v1  ;;  %2204 = vmatpush.msk.msra.mxu2 %vm137_vm1, %v120_v4  ;;  %v116_v7 = vld [vmem:[%s4937_s3 + $0x168] sm:$0xff]  ;;  %v111_v10 = vld [vmem:[%s4937_s3 + $0x140] sm:$0xff]  ;;  %v113_v13 = vld [vmem:[%s4937_s3 + $0x150] sm:$0xff] }
   0x5   :  { %154 = vmatpush.msra.mxu1 %v115_v6  ;;  %v112_v11 = vld [vmem:[%s4937_s3 + $0x148] sm:$0xff]  ;;  %v33_v12 = vld [vmem:[%s4934_s0] sm:$0x3]  ;;  %v122_v14 = vld [vmem:[%s4937_s3 + $0x198] sm:$0xf]  ;;  %194 = vmatpush.msra.mxu3 %v117_v8 }
   0x6   :  { %64 = vmatpush.msra.mxu0 %v35_v3  ;;  %174 = vmatpush.msra.mxu2 %v116_v7  ;;  %v107_v15 = vld [vmem:[%s4937_s3 + $0x120] sm:$0xff]  ;;  %v108_v16 = vld [vmem:[%s4937_s3 + $0x128] sm:$0xff]  ;;  %v109_v17 = vld [vmem:[%s4937_s3 + $0x130] sm:$0xff] }
   0x7   :  { %155 = vmatpush.msra.mxu1 %v111_v10  ;;  %v118_v18 = vld [vmem:[%s4937_s3 + $0x178] sm:$0xff]  ;;  %195 = vmatpush.msra.mxu3 %v113_v13  ;;  %v103_v19 = vld [vmem:[%s4937_s3 + $0x100] sm:$0xff]  ;;  %v104_v20 = vld [vmem:[%s4937_s3 + $0x108] sm:$0xff] }
   0x8   :  { %65 = vmatpush.msra.mxu0 %v34_v9  ;;  %175 = vmatpush.msra.mxu2 %v112_v11  ;;  %v105_v21 = vld [vmem:[%s4937_s3 + $0x110] sm:$0xff]  ;;  %v114_v22 = vld [vmem:[%s4937_s3 + $0x158] sm:$0xff]  ;;  %v99_v23 = vld [vmem:[%s4937_s3 + $0xe0] sm:$0xff] }
   0x9   :  { %2201 = vmatmul.msk.f32.vlgmr.msra.gmra.mxu0 %vm42_vm2, %v33_v12  ;;  %156 = vmatpush.msra.mxu1 %v107_v15  ;;  %v100_v24 = vld [vmem:[%s4937_s3 + $0xe8] sm:$0xff]  ;;  %v101_v25 = vld [vmem:[%s4937_s3 + $0xf0] sm:$0xff]  ;;  %v110_v26 = vld [vmem:[%s4937_s3 + $0x138] sm:$0xff] }
   0xa   :  { %2208 = vmatpush.msk.msrb.mxu0 %vm137_vm1, %v122_v14  ;;  %176 = vmatpush.msra.mxu2 %v108_v16  ;;  %v95_v27 = vld [vmem:[%s4937_s3 + $0xc0] sm:$0xff]  ;;  %v96_v28 = vld [vmem:[%s4937_s3 + $0xc8] sm:$0xff]  ;;  %v97_v29 = vld [vmem:[%s4937_s3 + $0xd0] sm:$0xff] }
   0xb   :  { %196 = vmatpush.msra.mxu3 %v109_v17  ;;  %157 = vmatpush.msra.mxu1 %v103_v19  ;;  %v106_v30 = vld [vmem:[%s4937_s3 + $0x118] sm:$0xff]  ;;  %v91_v31 = vld [vmem:[%s4937_s3 + $0xa0] sm:$0xff]  ;;  %v92_v32 = vld [vmem:[%s4937_s3 + $0xa8] sm:$0xff] }
   0xc   :  { %214 = vmatpush.msrb.mxu0 %v118_v18  ;;  %177 = vmatpush.msra.mxu2 %v104_v20  ;;  %v93_v33 = vld [vmem:[%s4937_s3 + $0xb0] sm:$0xff] }
   0xd   :  { %197 = vmatpush.msra.mxu3 %v105_v21  ;;  %158 = vmatpush.msra.mxu1 %v99_v23 }
   0xe   :  { %215 = vmatpush.msrb.mxu0 %v114_v22  ;;  %178 = vmatpush.msra.mxu2 %v100_v24 }
   0xf   :  { %198 = vmatpush.msra.mxu3 %v101_v25  ;;  %159 = vmatpush.msra.mxu1 %v95_v27 }
  0x10   :  { %216 = vmatpush.msrb.mxu0 %v110_v26 }
  0x11   :  { %14 = vsyncpa [#allocation3], 0  ;;  %v102_v34 = vld [vmem:[%s4937_s3 + $0xf8] sm:$0xff]  ;;  %179 = vmatpush.msra.mxu2 %v96_v28  ;;  %199 = vmatpush.msra.mxu3 %v97_v29  ;;  %v87_v35 = vld [vmem:[%s4937_s3 + $0x80] sm:$0xff]  ;;  %vm133_vm3 = vcmask 818176   ;;  %vm496_vm4 = vcmask 130048  }
  0x12   :  { %217 = vmatpush.msrb.mxu0 %v106_v30  ;;  %160 = vmatpush.msra.mxu1 %v91_v31  ;;  %v88_v36 = vld [vmem:[%s4937_s3 + $0x88] sm:$0xff]  ;;  %v89_v37 = vld [vmem:[%s4937_s3 + $0x90] sm:$0xff]  ;;  %v98_v38 = vld [vmem:[%s4937_s3 + $0xd8] sm:$0xff]  ;;  %vm1446_vm5 = vcmask 719872   ;;  %vm2169_vm6 = vcmask 1041408   ;;  %vm2171_vm7 = vcmask 1045508  }
  0x13   :  { %180 = vmatpush.msra.mxu2 %v92_v32  ;;  %200 = vmatpush.msra.mxu3 %v93_v33  ;;  %v83_v39 = vld [vmem:[%s4937_s3 + $0x60] sm:$0xff]  ;;  %v84_v40 = vld [vmem:[%s4937_s3 + $0x68] sm:$0xff]  ;;  %v85_v41 = vld [vmem:[%s4937_s3 + $0x70] sm:$0xff]  ;;  %vm2179_vm8 = vcmask 1043458   ;;  %vm2181_vm10 = vcmask 259076   ;;  %s2191_s26 = sshll.u32 %s4943_s9, 4  ;;  %s2192_s26 = int_to_ptr.hbm [resolvable:$true] %s2191_s26 }
  0x14   :  { %218 = vmatpush.msrb.mxu0 %v102_v34  ;;  %161 = vmatpush.msra.mxu1 %v87_v35  ;;  %v94_v42 = vld [vmem:[%s4937_s3 + $0xb8] sm:$0xff]  ;;  %v79_v45 = vld [vmem:[%s4937_s3 + $0x40] sm:$0xff]  ;;  %v80_v46 = vld [vmem:[%s4937_s3 + $0x48] sm:$0xff] }
  0x15   :  { %181 = vmatpush.msra.mxu2 %v88_v36  ;;  %201 = vmatpush.msra.mxu3 %v89_v37  ;;  %v90_v43 = vld [vmem:[%s4937_s3 + $0x98] sm:$0xff]  ;;  %v81_v47 = vld [vmem:[%s4937_s3 + $0x50] sm:$0xff]  ;;  %v75_v49 = vld [vmem:[%s4937_s3 + $0x20] sm:$0xff] }
  0x16   :  { %219 = vmatpush.msrb.mxu0 %v98_v38  ;;  %162 = vmatpush.msra.mxu1 %v83_v39  ;;  %v86_v44 = vld [vmem:[%s4937_s3 + $0x78] sm:$0xff]  ;;  %v76_v50 = vld [vmem:[%s4937_s3 + $0x28] sm:$0xff]  ;;  %v77_v51 = vld [vmem:[%s4937_s3 + $0x30] sm:$0xff] }
  0x17   :  { %182 = vmatpush.msra.mxu2 %v84_v40  ;;  %202 = vmatpush.msra.mxu3 %v85_v41  ;;  %v82_v48 = vld [vmem:[%s4937_s3 + $0x58] sm:$0xff]  ;;  %v71_v53 = vld [vmem:[%s4937_s3] sm:$0xff]  ;;  %v72_v54 = vld [vmem:[%s4937_s3 + $0x8] sm:$0xff] }
  0x18   :  { %220 = vmatpush.msrb.mxu0 %v94_v42  ;;  %163 = vmatpush.msra.mxu1 %v79_v45  ;;  %v78_v52 = vld [vmem:[%s4937_s3 + $0x38] sm:$0xff]  ;;  %v73_v55 = vld [vmem:[%s4937_s3 + $0x10] sm:$0xff]  ;;  %v299_v60 = vld [vmem:[%s4939_s5 + $0x208] sm:$0xff] }
  0x19   :  { %183 = vmatpush.msra.mxu2 %v80_v46  ;;  %203 = vmatpush.msra.mxu3 %v81_v47  ;;  %v74_v56 = vld [vmem:[%s4937_s3 + $0x18] sm:$0xff]  ;;  %v304_v58 = vld [vmem:[%s4939_s5 + $0x230] sm:$0xff]  ;;  %v379_v62 = vld [vmem:[%s4939_s5 + $0x488] sm:$0xff] }
  0x1a   :  { %221 = vmatpush.msrb.mxu0 %v90_v43  ;;  %164 = vmatpush.msra.mxu1 %v75_v49  ;;  %v309_v57 = vld [vmem:[%s4939_s5 + $0x258] sm:$0xff]  ;;  %v384_v61 = vld [vmem:[%s4939_s5 + $0x4b0] sm:$0xff]  ;;  %v294_v63 = vld [vmem:[%s4939_s5 + $0x1e0] sm:$0xff] }
  0x1b   :  { %184 = vmatpush.msra.mxu2 %v76_v50  ;;  %204 = vmatpush.msra.mxu3 %v77_v51  ;;  %v389_v59 = vld [vmem:[%s4939_s5 + $0x4d8] sm:$0xff]  ;;  %v374_v0 = vld [vmem:[%s4939_s5 + $0x460] sm:$0xff]  ;;  %v284_v3 = vld [vmem:[%s4939_s5 + $0x190] sm:$0xff] }
  0x1c   :  { %222 = vmatpush.msrb.mxu0 %v86_v44  ;;  %165 = vmatpush.msra.mxu1 %v71_v53  ;;  %v289_v1 = vld [vmem:[%s4939_s5 + $0x1b8] sm:$0xff]  ;;  %v364_v4 = vld [vmem:[%s4939_s5 + $0x410] sm:$0xff]  ;;  %v479_v5 = vld [vmem:[%s4939_s5 + $0x7a8] sm:$0xff] }
  0x1d   :  { %185 = vmatpush.msra.mxu2 %v72_v54  ;;  %205 = vmatpush.msra.mxu3 %v73_v55  ;;  %v369_v2 = vld [vmem:[%s4939_s5 + $0x438] sm:$0xff]  ;;  %v279_v6 = vld [vmem:[%s4939_s5 + $0x168] sm:$0xff]  ;;  %v474_v7 = vld [vmem:[%s4939_s5 + $0x780] sm:$0xff] }
  0x1e   :  { %223 = vmatpush.msrb.mxu0 %v82_v48  ;;  %500 = vmatpush.msrb.mxu1 %v309_v57  ;;  %v359_v8 = vld [vmem:[%s4939_s5 + $0x3e8] sm:$0xff]  ;;  %v274_v9 = vld [vmem:[%s4939_s5 + $0x140] sm:$0xff]  ;;  %v469_v10 = vld [vmem:[%s4939_s5 + $0x758] sm:$0xff] }
  0x1f   :  { %520 = vmatpush.msrb.mxu2 %v389_v59  ;;  %v354_v11 = vld [vmem:[%s4939_s5 + $0x3c0] sm:$0xff]  ;;  %540 = vmatpush.msrb.mxu3 %v469_v10  ;;  %v464_v12 = vld [vmem:[%s4939_s5 + $0x730] sm:$0xff]  ;;  %v269_v13 = vld [vmem:[%s4939_s5 + $0x118] sm:$0xff] }
  0x20   :  { %224 = vmatpush.msrb.mxu0 %v78_v52  ;;  %501 = vmatpush.msrb.mxu1 %v304_v58  ;;  %v349_v14 = vld [vmem:[%s4939_s5 + $0x398] sm:$0xff]  ;;  %v459_v15 = vld [vmem:[%s4939_s5 + $0x708] sm:$0xff]  ;;  %v264_v16 = vld [vmem:[%s4939_s5 + $0xf0] sm:$0xff] }
  0x21   :  { %521 = vmatpush.msrb.mxu2 %v384_v61  ;;  %541 = vmatpush.msrb.mxu3 %v464_v12  ;;  %v454_v17 = vld [vmem:[%s4939_s5 + $0x6e0] sm:$0xff]  ;;  %v344_v18 = vld [vmem:[%s4939_s5 + $0x370] sm:$0xff]  ;;  %v259_v19 = vld [vmem:[%s4939_s5 + $0xc8] sm:$0xff] }
  0x22   :  { %225 = vmatpush.msrb.mxu0 %v74_v56  ;;  %502 = vmatpush.msrb.mxu1 %v299_v60  ;;  %v449_v20 = vld [vmem:[%s4939_s5 + $0x6b8] sm:$0xff]  ;;  %v339_v21 = vld [vmem:[%s4939_s5 + $0x348] sm:$0xff]  ;;  %v254_v22 = vld [vmem:[%s4939_s5 + $0xa0] sm:$0xff] }
  0x23   :  { %522 = vmatpush.msrb.mxu2 %v379_v62  ;;  %542 = vmatpush.msrb.mxu3 %v459_v15  ;;  %v444_v23 = vld [vmem:[%s4939_s5 + $0x690] sm:$0xff]  ;;  %v334_v24 = vld [vmem:[%s4939_s5 + $0x320] sm:$0xff]  ;;  %v249_v25 = vld [vmem:[%s4939_s5 + $0x78] sm:$0xff] }
  0x24   :  { %503 = vmatpush.msrb.mxu1 %v294_v63  ;;  %574 = vmatpush.msra.mxu0 %v479_v5  ;;  %v439_v26 = vld [vmem:[%s4939_s5 + $0x668] sm:$0xff]  ;;  %v2223_v27 = vld [vmem:[%s4936_s2] ss:$0 sm:$0xff]  ;;  %v329_v28 = vld [vmem:[%s4939_s5 + $0x2f8] sm:$0xff] }
  0x25   :  { %523 = vmatpush.msrb.mxu2 %v374_v0  ;;  %543 = vmatpush.msrb.mxu3 %v454_v17  ;;  %v244_v29 = vld [vmem:[%s4939_s5 + $0x50] sm:$0xff]  ;;  %v434_v30 = vld [vmem:[%s4939_s5 + $0x640] sm:$0xff]  ;;  %v239_v33 = vld [vmem:[%s4939_s5 + $0x28] sm:$0xff] }
  0x26   :  { %504 = vmatpush.msrb.mxu1 %v289_v1  ;;  %575 = vmatpush.msra.mxu0 %v474_v7  ;;  %v324_v31 = vld [vmem:[%s4939_s5 + $0x2d0] sm:$0xff]  ;;  %v429_v34 = vld [vmem:[%s4939_s5 + $0x618] sm:$0xff]  ;;  %v319_v36 = vld [vmem:[%s4939_s5 + $0x2a8] sm:$0xff] }
  0x27   :  { %524 = vmatpush.msrb.mxu2 %v369_v2  ;;  %544 = vmatpush.msrb.mxu3 %v449_v20  ;;  %v234_v38 = vld [vmem:[%s4939_s5] sm:$0xff]  ;;  %v305_v42 = vld [vmem:[%s4939_s5 + $0x238] sm:$0xff]  ;;  %v424_v45 = vld [vmem:[%s4939_s5 + $0x5f0] sm:$0xff] }
  0x28   :  { %505 = vmatpush.msrb.mxu1 %v284_v3  ;;  %v310_v39 = vld [vmem:[%s4939_s5 + $0x260] sm:$0xff]  ;;  %v385_v44 = vld [vmem:[%s4939_s5 + $0x4b8] sm:$0xff]  ;;  %v300_v46 = vld [vmem:[%s4939_s5 + $0x210] sm:$0xff] }
  0x29   :  { %525 = vmatpush.msrb.mxu2 %v364_v4  ;;  %545 = vmatpush.msrb.mxu3 %v444_v23  ;;  %v390_v40 = vld [vmem:[%s4939_s5 + $0x4e0] sm:$0xff]  ;;  %v465_v47 = vld [vmem:[%s4939_s5 + $0x738] sm:$0xff]  ;;  %v380_v48 = vld [vmem:[%s4939_s5 + $0x490] sm:$0xff] }
  0x2a   :  { %506 = vmatpush.msrb.mxu1 %v279_v6  ;;  %v314_v41 = vld [vmem:[%s4939_s5 + $0x280] sm:$0xff]  ;;  %v419_v49 = vld [vmem:[%s4939_s5 + $0x5c8] sm:$0xff]  ;;  %v460_v51 = vld [vmem:[%s4939_s5 + $0x710] sm:$0xff] }
  0x2b   :  { %526 = vmatpush.msrb.mxu2 %v359_v8  ;;  %546 = vmatpush.msrb.mxu3 %v439_v26  ;;  %v470_v43 = vld [vmem:[%s4939_s5 + $0x760] sm:$0xff]  ;;  %v295_v50 = vld [vmem:[%s4939_s5 + $0x1e8] sm:$0xff]  ;;  %v285_v57 = vld [vmem:[%s4939_s5 + $0x198] sm:$0xff] }
  0x2c   :  { %507 = vmatpush.msrb.mxu1 %v274_v9  ;;  %v375_v52 = vld [vmem:[%s4939_s5 + $0x468] sm:$0xff]  ;;  %v414_v53 = vld [vmem:[%s4939_s5 + $0x5a0] sm:$0xff]  ;;  %v365_v59 = vld [vmem:[%s4939_s5 + $0x418] sm:$0xff] }
  0x2d   :  { %527 = vmatpush.msrb.mxu2 %v354_v11  ;;  %547 = vmatpush.msrb.mxu3 %v434_v30  ;;  %v290_v54 = vld [vmem:[%s4939_s5 + $0x1c0] sm:$0xff]  ;;  %v455_v55 = vld [vmem:[%s4939_s5 + $0x6e8] sm:$0xff]  ;;  %v280_v60 = vld [vmem:[%s4939_s5 + $0x170] sm:$0xff] }
  0x2e   :  { %508 = vmatpush.msrb.mxu1 %v269_v13  ;;  %v370_v56 = vld [vmem:[%s4939_s5 + $0x440] sm:$0xff]  ;;  %v445_v61 = vld [vmem:[%s4939_s5 + $0x698] sm:$0xff]  ;;  %v360_v62 = vld [vmem:[%s4939_s5 + $0x3f0] sm:$0xff] }
  0x2f   :  { %528 = vmatpush.msrb.mxu2 %v349_v14  ;;  %548 = vmatpush.msrb.mxu3 %v429_v34  ;;  %v450_v58 = vld [vmem:[%s4939_s5 + $0x6c0] sm:$0xff]  ;;  %v275_v63 = vld [vmem:[%s4939_s5 + $0x148] sm:$0xff]  ;;  %v440_v0 = vld [vmem:[%s4939_s5 + $0x670] sm:$0xff] }
  0x30   :  { %509 = vmatpush.msrb.mxu1 %v264_v16  ;;  %v355_v1 = vld [vmem:[%s4939_s5 + $0x3c8] sm:$0xff]  ;;  %v270_v2 = vld [vmem:[%s4939_s5 + $0x120] sm:$0xff]  ;;  %v265_v5 = vld [vmem:[%s4939_s5 + $0xf8] sm:$0xff] }
  0x31   :  { %529 = vmatpush.msrb.mxu2 %v344_v18  ;;  %549 = vmatpush.msrb.mxu3 %v424_v45  ;;  %v435_v3 = vld [vmem:[%s4939_s5 + $0x648] sm:$0xff]  ;;  %v350_v4 = vld [vmem:[%s4939_s5 + $0x3a0] sm:$0xff]  ;;  %v345_v7 = vld [vmem:[%s4939_s5 + $0x378] sm:$0xff] }
  0x32   :  { %510 = vmatpush.msrb.mxu1 %v259_v19  ;;  %v430_v6 = vld [vmem:[%s4939_s5 + $0x620] sm:$0xff]  ;;  %v260_v8 = vld [vmem:[%s4939_s5 + $0xd0] sm:$0xff]  ;;  %v425_v9 = vld [vmem:[%s4939_s5 + $0x5f8] sm:$0xff] }
  0x33   :  { %530 = vmatpush.msrb.mxu2 %v339_v21  ;;  %550 = vmatpush.msrb.mxu3 %v419_v49  ;;  %v340_v10 = vld [vmem:[%s4939_s5 + $0x350] sm:$0xff]  ;;  %v255_v11 = vld [vmem:[%s4939_s5 + $0xa8] sm:$0xff]  ;;  %v250_v13 = vld [vmem:[%s4939_s5 + $0x80] sm:$0xff] }
  0x34   :  { %511 = vmatpush.msrb.mxu1 %v254_v22  ;;  %v335_v12 = vld [vmem:[%s4939_s5 + $0x328] sm:$0xff]  ;;  %v330_v14 = vld [vmem:[%s4939_s5 + $0x300] sm:$0xff]  ;;  %v245_v15 = vld [vmem:[%s4939_s5 + $0x58] sm:$0xff] }
  0x35   :  { %531 = vmatpush.msrb.mxu2 %v334_v24  ;;  %551 = vmatpush.msrb.mxu3 %v414_v53  ;;  %v325_v16 = vld [vmem:[%s4939_s5 + $0x2d8] sm:$0xff]  ;;  %v420_v17 = vld [vmem:[%s4939_s5 + $0x5d0] sm:$0xff]  ;;  %v415_v21 = vld [vmem:[%s4939_s5 + $0x5a8] sm:$0xff] }
  0x36   :  { %512 = vmatpush.msrb.mxu1 %v249_v25  ;;  %v409_v18 = vld [vmem:[%s4939_s5 + $0x578] sm:$0xff]  ;;  %v240_v19 = vld [vmem:[%s4939_s5 + $0x30] sm:$0xff]  ;;  %v235_v23 = vld [vmem:[%s4939_s5 + $0x8] sm:$0xff] }
  0x37   :  { %532 = vmatpush.msrb.mxu2 %v329_v28  ;;  %552 = vmatpush.msrb.mxu3 %v409_v18  ;;  %v320_v20 = vld [vmem:[%s4939_s5 + $0x2b0] sm:$0xff]  ;;  %v315_v24 = vld [vmem:[%s4939_s5 + $0x288] sm:$0xff]  ;;  %v410_v25 = vld [vmem:[%s4939_s5 + $0x580] sm:$0xff] }
  0x38   :  { %513 = vmatpush.msrb.mxu1 %v244_v29  ;;  %v404_v22 = vld [vmem:[%s4939_s5 + $0x550] sm:$0xff]  ;;  %v399_v26 = vld [vmem:[%s4939_s5 + $0x528] sm:$0xff]  ;;  %v394_v28 = vld [vmem:[%s4939_s5 + $0x500] sm:$0xff] }
  0x39   :  { %533 = vmatpush.msrb.mxu2 %v324_v31  ;;  %553 = vmatpush.msrb.mxu3 %v404_v22  ;;  %v400_v29 = vld [vmem:[%s4939_s5 + $0x530] sm:$0xff]  ;;  %v395_v31 = vld [vmem:[%s4939_s5 + $0x508] sm:$0xff]  ;;  %v381_v53 = vld [vmem:[%s4939_s5 + $0x498] sm:$0xff] }
  0x3a   :  { %514 = vmatpush.msrb.mxu1 %v239_v33  ;;  %v480_v30 = vld [vmem:[%s4939_s5 + $0x7b0] sm:$0xff]  ;;  %v123_v33 = vld [vmem:[%s4938_s4] sm:$0xf]  ;;  %v421_v22 = vld [vmem:[%s4939_s5 + $0x5d8] sm:$0xff] }
  0x3b   :  { %534 = vmatpush.msrb.mxu2 %v319_v36  ;;  %554 = vmatpush.msrb.mxu3 %v399_v26  ;;  %v125_v34 = vperm.slane %v123_v33, 0  ;;  %v127_v45 = vperm.slane %v123_v33, 2  ;;  %v426_v18 = vld [vmem:[%s4939_s5 + $0x600] sm:$0xff]  ;;  %v416_v26 = vld [vmem:[%s4939_s5 + $0x5b0] sm:$0xff]  ;;  %vm2180_vm9 = vmor %vm2179_vm8, %vm2169_vm6 }
  0x3c   :  { %515 = vmatpush.msrb.mxu1 %v234_v38  ;;  %vm2182_vm11 = vmor %vm2181_vm10, %vm2180_vm9 }
  0x3d   :  { %535 = vmatpush.msrb.mxu2 %v314_v41  ;;  %555 = vmatpush.msrb.mxu3 %v394_v28  ;;  %v471_v41 = vld [vmem:[%s4939_s5 + $0x768] sm:$0xff]  ;;  %v266_v28 = vld [vmem:[%s4939_s5 + $0x100] sm:$0xff] }
  0x86   :  { %v67_v32 = vpop.f32.mrf.mxu0 }
  0x87   :  { %v68_v35 = vadd.f32 %v2223_v27, %v67_v32  ;;  %v405_v27 = vld [vmem:[%s4939_s5 + $0x558] sm:$0xff]  ;;  %v475_v32 = vld [vmem:[%s4939_s5 + $0x788] sm:$0xff] }
  0x89   :  { %v70_v37 = vmax.f32 %v68_v35, 0.0  ;;  %v128_v35 = vperm.slane %v123_v33, 3 }
  0x8b   :  { %2203 = vmatmul.msk.f32.vlgmr.msra.gmra.mxu1 %vm133_vm3, %v70_v37  ;;  %2205 = vmatmul.msk.f32.vlgmr.msra.gmra.mxu2 %vm133_vm3, %v70_v37 }
  0x8c   :  { %2207 = vmatmul.msk.f32.vlgmr.msra.gmra.mxu3 %vm133_vm3, %v70_v37  ;;  %2209 = vmatmul.msk.f32.vlgmr.msrb.gmra.mxu0 %vm133_vm3, %v70_v37 }
  0x8d   :  { %580 = vmatpush.msrb.mxu0 %v310_v39  ;;  %600 = vmatpush.msra.mxu1 %v390_v40 }
  0x8e   :  { %620 = vmatpush.msra.mxu2 %v470_v43  ;;  %654 = vmatpush.msra.mxu3 %v480_v30  ;;  %v411_v30 = vld [vmem:[%s4939_s5 + $0x588] sm:$0xff] }
  0x8f   :  { %581 = vmatpush.msrb.mxu0 %v305_v42  ;;  %601 = vmatpush.msra.mxu1 %v385_v44  ;;  %v126_v42 = vperm.slane %v123_v33, 1  ;;  %v391_v44 = vld [vmem:[%s4939_s5 + $0x4e8] sm:$0xff]  ;;  %v326_v33 = vld [vmem:[%s4939_s5 + $0x2e0] sm:$0xff] }
  0x90   :  { %621 = vmatpush.msra.mxu2 %v465_v47  ;;  %655 = vmatpush.msra.mxu3 %v475_v32  ;;  %v261_v32 = vld [vmem:[%s4939_s5 + $0xd8] sm:$0xff] }
  0x91   :  { %582 = vmatpush.msrb.mxu0 %v300_v46  ;;  %602 = vmatpush.msra.mxu1 %v380_v48  ;;  %v466_v46 = vld [vmem:[%s4939_s5 + $0x740] sm:$0xff] }
  0x92   :  { %622 = vmatpush.msra.mxu2 %v460_v51  ;;  %v386_v48 = vld [vmem:[%s4939_s5 + $0x4c0] sm:$0xff]  ;;  %v461_v51 = vld [vmem:[%s4939_s5 + $0x718] sm:$0xff] }
  0x93   :  { %583 = vmatpush.msrb.mxu0 %v295_v50  ;;  %603 = vmatpush.msra.mxu1 %v375_v52 }
  0x94   :  { %623 = vmatpush.msra.mxu2 %v455_v55  ;;  %v456_v55 = vld [vmem:[%s4939_s5 + $0x6f0] sm:$0xff] }
  0x95   :  { %584 = vmatpush.msrb.mxu0 %v290_v54  ;;  %604 = vmatpush.msra.mxu1 %v370_v56 }
  0x96   :  { %624 = vmatpush.msra.mxu2 %v450_v58  ;;  %v376_v58 = vld [vmem:[%s4939_s5 + $0x470] sm:$0xff] }
  0x97   :  { %585 = vmatpush.msrb.mxu0 %v285_v57  ;;  %605 = vmatpush.msra.mxu1 %v365_v59  ;;  %v311_v57 = vld [vmem:[%s4939_s5 + $0x268] sm:$0xff]  ;;  %v312_v59 = vld [vmem:[%s4939_s5 + $0x270] sm:$0xff] }
  0x98   :  { %625 = vmatpush.msra.mxu2 %v445_v61  ;;  %v371_v61 = vld [vmem:[%s4939_s5 + $0x448] sm:$0xff] }
  0x99   :  { %586 = vmatpush.msrb.mxu0 %v280_v60  ;;  %606 = vmatpush.msra.mxu1 %v360_v62  ;;  %v306_v60 = vld [vmem:[%s4939_s5 + $0x240] sm:$0xff]  ;;  %v451_v62 = vld [vmem:[%s4939_s5 + $0x6c8] sm:$0xff] }
  0x9a   :  { %626 = vmatpush.msra.mxu2 %v440_v0  ;;  %v301_v0 = vld [vmem:[%s4939_s5 + $0x218] sm:$0xff] }
  0x9b   :  { %587 = vmatpush.msrb.mxu0 %v275_v63  ;;  %607 = vmatpush.msra.mxu1 %v355_v1  ;;  %v307_v63 = vld [vmem:[%s4939_s5 + $0x248] sm:$0xff]  ;;  %v366_v1 = vld [vmem:[%s4939_s5 + $0x420] sm:$0xff] }
  0x9c   :  { %627 = vmatpush.msra.mxu2 %v435_v3  ;;  %v302_v3 = vld [vmem:[%s4939_s5 + $0x220] sm:$0xff] }
  0x9d   :  { %588 = vmatpush.msrb.mxu0 %v270_v2  ;;  %608 = vmatpush.msra.mxu1 %v350_v4  ;;  %v446_v2 = vld [vmem:[%s4939_s5 + $0x6a0] sm:$0xff]  ;;  %v296_v4 = vld [vmem:[%s4939_s5 + $0x1f0] sm:$0xff] }
  0x9e   :  { %628 = vmatpush.msra.mxu2 %v430_v6  ;;  %v441_v6 = vld [vmem:[%s4939_s5 + $0x678] sm:$0xff] }
  0x9f   :  { %589 = vmatpush.msrb.mxu0 %v265_v5  ;;  %609 = vmatpush.msra.mxu1 %v345_v7  ;;  %v361_v5 = vld [vmem:[%s4939_s5 + $0x3f8] sm:$0xff] }
  0xa0   :  { %629 = vmatpush.msra.mxu2 %v425_v9  ;;  %v297_v7 = vld [vmem:[%s4939_s5 + $0x1f8] sm:$0xff]  ;;  %v356_v9 = vld [vmem:[%s4939_s5 + $0x3d0] sm:$0xff] }
  0xa1   :  { %590 = vmatpush.msrb.mxu0 %v260_v8  ;;  %610 = vmatpush.msra.mxu1 %v340_v10  ;;  %v291_v8 = vld [vmem:[%s4939_s5 + $0x1c8] sm:$0xff]  ;;  %v436_v10 = vld [vmem:[%s4939_s5 + $0x650] sm:$0xff] }
  0xa2   :  { %630 = vmatpush.msra.mxu2 %v420_v17  ;;  %v346_v17 = vld [vmem:[%s4939_s5 + $0x380] sm:$0xff] }
  0xa3   :  { %591 = vmatpush.msrb.mxu0 %v255_v11  ;;  %611 = vmatpush.msra.mxu1 %v335_v12  ;;  %v292_v11 = vld [vmem:[%s4939_s5 + $0x1d0] sm:$0xff]  ;;  %v286_v12 = vld [vmem:[%s4939_s5 + $0x1a0] sm:$0xff] }
  0xa4   :  { %631 = vmatpush.msra.mxu2 %v415_v21  ;;  %v341_v21 = vld [vmem:[%s4939_s5 + $0x358] sm:$0xff] }
  0xa5   :  { %592 = vmatpush.msrb.mxu0 %v250_v13  ;;  %612 = vmatpush.msra.mxu1 %v330_v14  ;;  %v351_v13 = vld [vmem:[%s4939_s5 + $0x3a8] sm:$0xff] }
  0xa6   :  { %632 = vmatpush.msra.mxu2 %v410_v25  ;;  %v431_v14 = vld [vmem:[%s4939_s5 + $0x628] sm:$0xff]  ;;  %v336_v25 = vld [vmem:[%s4939_s5 + $0x330] sm:$0xff] }
  0xa7   :  { %593 = vmatpush.msrb.mxu0 %v245_v15  ;;  %613 = vmatpush.msra.mxu1 %v325_v16  ;;  %v287_v15 = vld [vmem:[%s4939_s5 + $0x1a8] sm:$0xff]  ;;  %v281_v16 = vld [vmem:[%s4939_s5 + $0x178] sm:$0xff] }
  0xa8   :  { %633 = vmatpush.msra.mxu2 %v405_v27  ;;  %v272_v27 = vld [vmem:[%s4939_s5 + $0x130] sm:$0xff] }
  0xa9   :  { %594 = vmatpush.msrb.mxu0 %v240_v19  ;;  %614 = vmatpush.msra.mxu1 %v320_v20  ;;  %v282_v19 = vld [vmem:[%s4939_s5 + $0x180] sm:$0xff]  ;;  %v276_v20 = vld [vmem:[%s4939_s5 + $0x150] sm:$0xff] }
  0xaa   :  { %634 = vmatpush.msra.mxu2 %v400_v29  ;;  %v331_v29 = vld [vmem:[%s4939_s5 + $0x308] sm:$0xff] }
  0xab   :  { %595 = vmatpush.msrb.mxu0 %v235_v23  ;;  %615 = vmatpush.msra.mxu1 %v315_v24  ;;  %v277_v23 = vld [vmem:[%s4939_s5 + $0x158] sm:$0xff]  ;;  %v271_v24 = vld [vmem:[%s4939_s5 + $0x128] sm:$0xff] }
  0xac   :  { %635 = vmatpush.msra.mxu2 %v395_v31  ;;  %v267_v31 = vld [vmem:[%s4939_s5 + $0x108] sm:$0xff] }
 0x108   :  { %v167_v36 = vpop.f32.mrf.mxu1 }
 0x109   :  { %v168_v37 = vadd.f32 %v167_v36, %v125_v34  ;;  %v227_v38 = vpop.f32.mrf.mxu0  ;;  %v406_v34 = vld [vmem:[%s4939_s5 + $0x560] sm:$0xff]  ;;  %v256_v36 = vld [vmem:[%s4939_s5 + $0xb0] sm:$0xff] }
 0x10a   :  { %v228_v39 = vadd.f32 %v227_v38, %v128_v35  ;;  %v262_v35 = vld [vmem:[%s4939_s5 + $0xe0] sm:$0xff]  ;;  %v401_v38 = vld [vmem:[%s4939_s5 + $0x538] sm:$0xff] }
 0x10b   :  { %v2782_v40 = vmax.f32 %v168_v37, 0.0  ;;  %v321_v37 = vld [vmem:[%s4939_s5 + $0x2b8] sm:$0xff] }
 0x10c   :  { %v2787_v43 = vmax.f32 %v228_v39, 0.0  ;;  %v257_v39 = vld [vmem:[%s4939_s5 + $0xb8] sm:$0xff] }
 0x10d   :  { %516 = vmatmul.f32.vlgmr.msrb.gmra.mxu1 %v2782_v40 }
 0x10e   :  { %2210 = vmatmul.msk.f32.vlgmr.msra.gmra.mxu0 %vm496_vm4, %v2787_v43  ;;  %700 = vmatpush.msrb.mxu1 %v471_v41  ;;  %v187_v47 = vpop.f32.mrf.mxu2  ;;  %v251_v41 = vld [vmem:[%s4939_s5 + $0x88] sm:$0xff] }
 0x10f   :  { %680 = vmatpush.msra.mxu0 %v391_v44  ;;  %v188_v49 = vadd.f32 %v187_v47, %v126_v42  ;;  %v207_v50 = vpop.f32.mrf.mxu3  ;;  %v316_v42 = vld [vmem:[%s4939_s5 + $0x290] sm:$0xff]  ;;  %v313_v47 = vld [vmem:[%s4939_s5 + $0x278] sm:$0xff] }
 0x110   :  { %v208_v52 = vadd.f32 %v207_v50, %v127_v45  ;;  %701 = vmatpush.msrb.mxu1 %v466_v46  ;;  %v396_v44 = vld [vmem:[%s4939_s5 + $0x510] sm:$0xff]  ;;  %v481_v46 = vld [vmem:[%s4939_s5 + $0x7b8] sm:$0xff] }
 0x111   :  { %v2807_v54 = vmax.f32 %v188_v49, 0.0  ;;  %681 = vmatpush.msra.mxu0 %v386_v48  ;;  %v252_v45 = vld [vmem:[%s4939_s5 + $0x90] sm:$0xff]  ;;  %v246_v48 = vld [vmem:[%s4939_s5 + $0x60] sm:$0xff]  ;;  %v247_v49 = vld [vmem:[%s4939_s5 + $0x68] sm:$0xff] }
 0x112   :  { %v2812_v56 = vmax.f32 %v208_v52, 0.0  ;;  %702 = vmatpush.msrb.mxu1 %v461_v51  ;;  %v476_v50 = vld [vmem:[%s4939_s5 + $0x790] sm:$0xff]  ;;  %v241_v52 = vld [vmem:[%s4939_s5 + $0x38] sm:$0xff] }
 0x113   :  { %682 = vmatpush.msra.mxu0 %v381_v53  ;;  %536 = vmatmul.f32.vlgmr.msrb.gmra.mxu2 %v2807_v54  ;;  %v308_v51 = vld [vmem:[%s4939_s5 + $0x250] sm:$0xff]  ;;  %v242_v53 = vld [vmem:[%s4939_s5 + $0x40] sm:$0xff] }
 0x114   :  { %556 = vmatmul.f32.vlgmr.msrb.gmra.mxu3 %v2812_v56  ;;  %703 = vmatpush.msrb.mxu1 %v456_v55  ;;  %v472_v55 = vld [vmem:[%s4939_s5 + $0x770] sm:$0xff] }
 0x115   :  { %660 = vmatpush.msrb.mxu3 %v311_v57  ;;  %683 = vmatpush.msra.mxu0 %v376_v58  ;;  %v303_v57 = vld [vmem:[%s4939_s5 + $0x228] sm:$0xff]  ;;  %v236_v58 = vld [vmem:[%s4939_s5 + $0x10] sm:$0xff] }
 0x116   :  { %740 = vmatpush.msrb.mxu2 %v312_v59  ;;  %596 = vmatmul.f32.vlgmr.msrb.gmra.mxu0 %v2782_v40  ;;  %v237_v59 = vld [vmem:[%s4939_s5 + $0x18] sm:$0xff] }
 0x117   :  { %616 = vmatmul.f32.vlgmr.msra.gmra.mxu1 %v2807_v54  ;;  %661 = vmatpush.msrb.mxu3 %v306_v60  ;;  %v467_v60 = vld [vmem:[%s4939_s5 + $0x748] sm:$0xff] }
 0x118   :  { %684 = vmatpush.msra.mxu0 %v371_v61  ;;  %704 = vmatpush.msrb.mxu1 %v451_v62  ;;  %v392_v61 = vld [vmem:[%s4939_s5 + $0x4f0] sm:$0xff]  ;;  %v298_v62 = vld [vmem:[%s4939_s5 + $0x200] sm:$0xff] }
 0x119   :  { %741 = vmatpush.msrb.mxu2 %v307_v63  ;;  %662 = vmatpush.msrb.mxu3 %v301_v0  ;;  %v393_v63 = vld [vmem:[%s4939_s5 + $0x4f8] sm:$0xff]  ;;  %v462_v0 = vld [vmem:[%s4939_s5 + $0x720] sm:$0xff] }
 0x11a   :  { %685 = vmatpush.msra.mxu0 %v366_v1  ;;  %705 = vmatpush.msrb.mxu1 %v446_v2  ;;  %v387_v1 = vld [vmem:[%s4939_s5 + $0x4c8] sm:$0xff]  ;;  %v293_v2 = vld [vmem:[%s4939_s5 + $0x1d8] sm:$0xff] }
 0x11b   :  { %742 = vmatpush.msrb.mxu2 %v302_v3  ;;  %663 = vmatpush.msrb.mxu3 %v296_v4  ;;  %v388_v3 = vld [vmem:[%s4939_s5 + $0x4d0] sm:$0xff]  ;;  %v457_v4 = vld [vmem:[%s4939_s5 + $0x6f8] sm:$0xff] }
 0x11c   :  { %686 = vmatpush.msra.mxu0 %v361_v5  ;;  %706 = vmatpush.msrb.mxu1 %v441_v6  ;;  %v382_v5 = vld [vmem:[%s4939_s5 + $0x4a0] sm:$0xff]  ;;  %v288_v6 = vld [vmem:[%s4939_s5 + $0x1b0] sm:$0xff] }
 0x11d   :  { %743 = vmatpush.msrb.mxu2 %v297_v7  ;;  %2211 = vmatmul.msk.f32.vlgmr.msra.gmra.mxu3 %vm496_vm4, %v2787_v43  ;;  %v383_v7 = vld [vmem:[%s4939_s5 + $0x4a8] sm:$0xff] }
 0x11e   :  { %636 = vmatmul.f32.vlgmr.msra.gmra.mxu2 %v2812_v56  ;;  %664 = vmatpush.msrb.mxu3 %v291_v8  ;;  %v452_v8 = vld [vmem:[%s4939_s5 + $0x6d0] sm:$0xff] }
 0x11f   :  { %687 = vmatpush.msra.mxu0 %v356_v9  ;;  %707 = vmatpush.msrb.mxu1 %v436_v10  ;;  %v377_v9 = vld [vmem:[%s4939_s5 + $0x478] sm:$0xff]  ;;  %v283_v10 = vld [vmem:[%s4939_s5 + $0x188] sm:$0xff] }
 0x120   :  { %744 = vmatpush.msrb.mxu2 %v292_v11  ;;  %665 = vmatpush.msrb.mxu3 %v286_v12  ;;  %v378_v11 = vld [vmem:[%s4939_s5 + $0x480] sm:$0xff]  ;;  %v447_v12 = vld [vmem:[%s4939_s5 + $0x6a8] sm:$0xff] }
 0x121   :  { %688 = vmatpush.msra.mxu0 %v351_v13  ;;  %708 = vmatpush.msrb.mxu1 %v431_v14  ;;  %v372_v13 = vld [vmem:[%s4939_s5 + $0x450] sm:$0xff]  ;;  %v278_v14 = vld [vmem:[%s4939_s5 + $0x160] sm:$0xff] }
 0x122   :  { %745 = vmatpush.msrb.mxu2 %v287_v15  ;;  %666 = vmatpush.msrb.mxu3 %v281_v16  ;;  %v373_v15 = vld [vmem:[%s4939_s5 + $0x458] sm:$0xff]  ;;  %v442_v16 = vld [vmem:[%s4939_s5 + $0x680] sm:$0xff] }
 0x123   :  { %689 = vmatpush.msra.mxu0 %v346_v17  ;;  %709 = vmatpush.msrb.mxu1 %v426_v18  ;;  %v367_v17 = vld [vmem:[%s4939_s5 + $0x428] sm:$0xff]  ;;  %v273_v18 = vld [vmem:[%s4939_s5 + $0x138] sm:$0xff] }
 0x124   :  { %746 = vmatpush.msrb.mxu2 %v282_v19  ;;  %667 = vmatpush.msrb.mxu3 %v276_v20  ;;  %v368_v19 = vld [vmem:[%s4939_s5 + $0x430] sm:$0xff]  ;;  %v437_v20 = vld [vmem:[%s4939_s5 + $0x658] sm:$0xff] }
 0x125   :  { %690 = vmatpush.msra.mxu0 %v341_v21  ;;  %710 = vmatpush.msrb.mxu1 %v421_v22  ;;  %v362_v21 = vld [vmem:[%s4939_s5 + $0x400] sm:$0xff]  ;;  %v268_v22 = vld [vmem:[%s4939_s5 + $0x110] sm:$0xff] }
 0x126   :  { %747 = vmatpush.msrb.mxu2 %v277_v23  ;;  %668 = vmatpush.msrb.mxu3 %v271_v24  ;;  %v363_v23 = vld [vmem:[%s4939_s5 + $0x408] sm:$0xff]  ;;  %v432_v24 = vld [vmem:[%s4939_s5 + $0x630] sm:$0xff] }
 0x127   :  { %691 = vmatpush.msra.mxu0 %v336_v25  ;;  %711 = vmatpush.msrb.mxu1 %v416_v26  ;;  %v357_v25 = vld [vmem:[%s4939_s5 + $0x3d8] sm:$0xff]  ;;  %v263_v26 = vld [vmem:[%s4939_s5 + $0xe8] sm:$0xff] }
 0x128   :  { %748 = vmatpush.msrb.mxu2 %v272_v27  ;;  %669 = vmatpush.msrb.mxu3 %v266_v28  ;;  %v358_v27 = vld [vmem:[%s4939_s5 + $0x3e0] sm:$0xff]  ;;  %v427_v28 = vld [vmem:[%s4939_s5 + $0x608] sm:$0xff] }
 0x129   :  { %692 = vmatpush.msra.mxu0 %v331_v29  ;;  %712 = vmatpush.msrb.mxu1 %v411_v30  ;;  %v352_v29 = vld [vmem:[%s4939_s5 + $0x3b0] sm:$0xff]  ;;  %v258_v30 = vld [vmem:[%s4939_s5 + $0xc0] sm:$0xff] }
 0x12a   :  { %749 = vmatpush.msrb.mxu2 %v267_v31  ;;  %670 = vmatpush.msrb.mxu3 %v261_v32  ;;  %v353_v31 = vld [vmem:[%s4939_s5 + $0x3b8] sm:$0xff]  ;;  %v422_v32 = vld [vmem:[%s4939_s5 + $0x5e0] sm:$0xff] }
 0x12b   :  { %693 = vmatpush.msra.mxu0 %v326_v33  ;;  %713 = vmatpush.msrb.mxu1 %v406_v34  ;;  %v347_v33 = vld [vmem:[%s4939_s5 + $0x388] sm:$0xff]  ;;  %v253_v34 = vld [vmem:[%s4939_s5 + $0x98] sm:$0xff] }
 0x12c   :  { %750 = vmatpush.msrb.mxu2 %v262_v35  ;;  %671 = vmatpush.msrb.mxu3 %v256_v36  ;;  %v348_v35 = vld [vmem:[%s4939_s5 + $0x390] sm:$0xff]  ;;  %v417_v36 = vld [vmem:[%s4939_s5 + $0x5b8] sm:$0xff] }
 0x12d   :  { %694 = vmatpush.msra.mxu0 %v321_v37  ;;  %714 = vmatpush.msrb.mxu1 %v401_v38  ;;  %v342_v37 = vld [vmem:[%s4939_s5 + $0x360] sm:$0xff]  ;;  %v248_v38 = vld [vmem:[%s4939_s5 + $0x70] sm:$0xff] }
 0x12e   :  { %751 = vmatpush.msrb.mxu2 %v257_v39  ;;  %672 = vmatpush.msrb.mxu3 %v251_v41  ;;  %v343_v39 = vld [vmem:[%s4939_s5 + $0x368] sm:$0xff]  ;;  %v412_v41 = vld [vmem:[%s4939_s5 + $0x590] sm:$0xff] }
 0x12f   :  { %695 = vmatpush.msra.mxu0 %v316_v42  ;;  %715 = vmatpush.msrb.mxu1 %v396_v44  ;;  %v337_v42 = vld [vmem:[%s4939_s5 + $0x338] sm:$0xff]  ;;  %v243_v44 = vld [vmem:[%s4939_s5 + $0x48] sm:$0xff] }
 0x130   :  { %752 = vmatpush.msrb.mxu2 %v252_v45  ;;  %696 = vmatmul.f32.vlgmr.msra.gmra.mxu0 %v2807_v54  ;;  %v338_v45 = vld [vmem:[%s4939_s5 + $0x340] sm:$0xff] }
 0x131   :  { %716 = vmatmul.f32.vlgmr.msrb.gmra.mxu1 %v2812_v56  ;;  %734 = vmatpush.msrb.mxu0 %v481_v46  ;;  %v407_v46 = vld [vmem:[%s4939_s5 + $0x568] sm:$0xff] }
 0x132   :  { %820 = vmatpush.msra.mxu1 %v313_v47  ;;  %673 = vmatpush.msrb.mxu3 %v246_v48  ;;  %v332_v47 = vld [vmem:[%s4939_s5 + $0x310] sm:$0xff]  ;;  %v238_v48 = vld [vmem:[%s4939_s5 + $0x20] sm:$0xff] }
 0x133   :  { %753 = vmatpush.msrb.mxu2 %v247_v49  ;;  %735 = vmatpush.msrb.mxu0 %v476_v50  ;;  %v333_v49 = vld [vmem:[%s4939_s5 + $0x318] sm:$0xff]  ;;  %v402_v50 = vld [vmem:[%s4939_s5 + $0x540] sm:$0xff] }
 0x134   :  { %821 = vmatpush.msra.mxu1 %v308_v51  ;;  %674 = vmatpush.msrb.mxu3 %v241_v52  ;;  %v327_v51 = vld [vmem:[%s4939_s5 + $0x2e8] sm:$0xff]  ;;  %v328_v52 = vld [vmem:[%s4939_s5 + $0x2f0] sm:$0xff] }
 0x135   :  { %754 = vmatpush.msrb.mxu2 %v242_v53  ;;  %780 = vmatpush.msra.mxu0 %v472_v55  ;;  %v397_v53 = vld [vmem:[%s4939_s5 + $0x518] sm:$0xff]  ;;  %v322_v55 = vld [vmem:[%s4939_s5 + $0x2c0] sm:$0xff] }
 0x136   :  { %822 = vmatpush.msra.mxu1 %v303_v57  ;;  %675 = vmatpush.msrb.mxu3 %v236_v58  ;;  %v323_v57 = vld [vmem:[%s4939_s5 + $0x2c8] sm:$0xff] }
 0x137   :  { %755 = vmatpush.msrb.mxu2 %v237_v59  ;;  %781 = vmatpush.msra.mxu0 %v467_v60  ;;  %v483_v58 = vld [vmem:[%s4939_s5 + $0x7c8] sm:$0xff]  ;;  %v317_v59 = vld [vmem:[%s4939_s5 + $0x298] sm:$0xff]  ;;  %v482_v60 = vld [vmem:[%s4939_s5 + $0x7c0] sm:$0xff] }
 0x138   :  { %676 = vmatmul.f32.vlgmr.msrb.gmra.mxu3 %v2782_v40  ;;  %756 = vmatmul.f32.vlgmr.msrb.gmra.mxu2 %v2782_v40 }
 0x139   :  { %760 = vmatpush.msra.mxu3 %v392_v61  ;;  %823 = vmatpush.msra.mxu1 %v298_v62  ;;  %v1122_v61 = vld [vmem:[%s4941_s7 + $0x6c8] sm:$0xff]  ;;  %v478_v62 = vld [vmem:[%s4939_s5 + $0x7a0] sm:$0xff] }
 0x13a   :  { %840 = vmatpush.msra.mxu2 %v393_v63  ;;  %782 = vmatpush.msra.mxu0 %v462_v0  ;;  %v477_v63 = vld [vmem:[%s4939_s5 + $0x798] sm:$0xff]  ;;  %v1115_v0 = vld [vmem:[%s4941_s7 + $0x690] sm:$0xff] }
 0x13b   :  { %2212 = vmatmul.msk.f32.vlgmr.msrb.gmra.mxu0 %vm496_vm4, %v2787_v43  ;;  %761 = vmatpush.msra.mxu3 %v387_v1  ;;  %v473_v1 = vld [vmem:[%s4939_s5 + $0x778] sm:$0xff] }
 0x13c   :  { %824 = vmatpush.msra.mxu1 %v293_v2  ;;  %841 = vmatpush.msra.mxu2 %v388_v3  ;;  %v1108_v2 = vld [vmem:[%s4941_s7 + $0x658] sm:$0xff]  ;;  %v468_v3 = vld [vmem:[%s4939_s5 + $0x750] sm:$0xff] }
 0x13d   :  { %783 = vmatpush.msra.mxu0 %v457_v4  ;;  %762 = vmatpush.msra.mxu3 %v382_v5  ;;  %v1101_v4 = vld [vmem:[%s4941_s7 + $0x620] sm:$0xff]  ;;  %v1094_v5 = vld [vmem:[%s4941_s7 + $0x5e8] sm:$0xff] }
 0x13e   :  { %825 = vmatpush.msra.mxu1 %v288_v6  ;;  %842 = vmatpush.msra.mxu2 %v383_v7  ;;  %v1010_v6 = vld [vmem:[%s4941_s7 + $0x348] sm:$0xff]  ;;  %v1003_v7 = vld [vmem:[%s4941_s7 + $0x310] sm:$0xff] }
 0x13f   :  { %784 = vmatpush.msra.mxu0 %v452_v8  ;;  %763 = vmatpush.msra.mxu3 %v377_v9  ;;  %v1234_v8 = vld [vmem:[%s4941_s7 + $0xa48] sm:$0xff]  ;;  %v458_v9 = vld [vmem:[%s4939_s5 + $0x700] sm:$0xff] }
 0x140   :  { %826 = vmatpush.msra.mxu1 %v283_v10  ;;  %843 = vmatpush.msra.mxu2 %v378_v11  ;;  %v1087_v10 = vld [vmem:[%s4941_s7 + $0x5b0] sm:$0xff]  ;;  %v996_v11 = vld [vmem:[%s4941_s7 + $0x2d8] sm:$0xff] }
 0x141   :  { %785 = vmatpush.msra.mxu0 %v447_v12  ;;  %764 = vmatpush.msra.mxu3 %v372_v13  ;;  %v1227_v12 = vld [vmem:[%s4941_s7 + $0xa10] sm:$0xff]  ;;  %v453_v13 = vld [vmem:[%s4939_s5 + $0x6d8] sm:$0xff] }
 0x142   :  { %827 = vmatpush.msra.mxu1 %v278_v14  ;;  %844 = vmatpush.msra.mxu2 %v373_v15  ;;  %v1080_v14 = vld [vmem:[%s4941_s7 + $0x578] sm:$0xff]  ;;  %v989_v15 = vld [vmem:[%s4941_s7 + $0x2a0] sm:$0xff] }
 0x143   :  { %786 = vmatpush.msra.mxu0 %v442_v16  ;;  %765 = vmatpush.msra.mxu3 %v367_v17  ;;  %v1220_v16 = vld [vmem:[%s4941_s7 + $0x9d8] sm:$0xff]  ;;  %v1073_v17 = vld [vmem:[%s4941_s7 + $0x540] sm:$0xff] }
 0x144   :  { %828 = vmatpush.msra.mxu1 %v273_v18  ;;  %845 = vmatpush.msra.mxu2 %v368_v19  ;;  %v982_v18 = vld [vmem:[%s4941_s7 + $0x268] sm:$0xff]  ;;  %v1213_v19 = vld [vmem:[%s4941_s7 + $0x9a0] sm:$0xff] }
 0x145   :  { %787 = vmatpush.msra.mxu0 %v437_v20  ;;  %766 = vmatpush.msra.mxu3 %v362_v21  ;;  %v443_v20 = vld [vmem:[%s4939_s5 + $0x688] sm:$0xff] }
 0x146   :  { %829 = vmatpush.msra.mxu1 %v268_v22  ;;  %846 = vmatpush.msra.mxu2 %v363_v23  ;;  %v1066_v21 = vld [vmem:[%s4941_s7 + $0x508] sm:$0xff]  ;;  %v438_v22 = vld [vmem:[%s4939_s5 + $0x660] sm:$0xff]  ;;  %v1059_v23 = vld [vmem:[%s4941_s7 + $0x4d0] sm:$0xff] }
 0x147   :  { %788 = vmatpush.msra.mxu0 %v432_v24  ;;  %767 = vmatpush.msra.mxu3 %v357_v25  ;;  %v433_v24 = vld [vmem:[%s4939_s5 + $0x638] sm:$0xff] }
 0x148   :  { %830 = vmatpush.msra.mxu1 %v263_v26  ;;  %847 = vmatpush.msra.mxu2 %v358_v27  ;;  %v1052_v25 = vld [vmem:[%s4941_s7 + $0x498] sm:$0xff]  ;;  %v428_v26 = vld [vmem:[%s4939_s5 + $0x610] sm:$0xff] }
 0x149   :  { %789 = vmatpush.msra.mxu0 %v427_v28  ;;  %768 = vmatpush.msra.mxu3 %v352_v29  ;;  %v975_v27 = vld [vmem:[%s4941_s7 + $0x230] sm:$0xff]  ;;  %v1206_v28 = vld [vmem:[%s4941_s7 + $0x968] sm:$0xff]  ;;  %v1045_v29 = vld [vmem:[%s4941_s7 + $0x460] sm:$0xff] }
 0x14a   :  { %831 = vmatpush.msra.mxu1 %v258_v30  ;;  %848 = vmatpush.msra.mxu2 %v353_v31  ;;  %v968_v30 = vld [vmem:[%s4941_s7 + $0x1f8] sm:$0xff]  ;;  %v1199_v31 = vld [vmem:[%s4941_s7 + $0x930] sm:$0xff] }
 0x14b   :  { %790 = vmatpush.msra.mxu0 %v422_v32  ;;  %769 = vmatpush.msra.mxu3 %v347_v33  ;;  %v961_v32 = vld [vmem:[%s4941_s7 + $0x1c0] sm:$0xff]  ;;  %v1192_v33 = vld [vmem:[%s4941_s7 + $0x8f8] sm:$0xff] }
 0x14c   :  { %832 = vmatpush.msra.mxu1 %v253_v34  ;;  %849 = vmatpush.msra.mxu2 %v348_v35  ;;  %v423_v34 = vld [vmem:[%s4939_s5 + $0x5e8] sm:$0xff] }
 0x14d   :  { %791 = vmatpush.msra.mxu0 %v417_v36  ;;  %770 = vmatpush.msra.mxu3 %v342_v37  ;;  %v1038_v35 = vld [vmem:[%s4941_s7 + $0x428] sm:$0xff]  ;;  %v1185_v37 = vld [vmem:[%s4941_s7 + $0x8c0] sm:$0xff] }
 0x14e   :  { %833 = vmatpush.msra.mxu1 %v248_v38  ;;  %850 = vmatpush.msra.mxu2 %v343_v39  ;;  %v954_v36 = vld [vmem:[%s4941_s7 + $0x188] sm:$0xff]  ;;  %v418_v38 = vld [vmem:[%s4939_s5 + $0x5c0] sm:$0xff]  ;;  %v1031_v39 = vld [vmem:[%s4941_s7 + $0x3f0] sm:$0xff] }
 0x14f   :  { %792 = vmatpush.msra.mxu0 %v412_v41  ;;  %771 = vmatpush.msra.mxu3 %v337_v42  ;;  %v413_v41 = vld [vmem:[%s4939_s5 + $0x598] sm:$0xff] }
 0x150   :  { %834 = vmatpush.msra.mxu1 %v243_v44  ;;  %851 = vmatpush.msra.mxu2 %v338_v45  ;;  %v1024_v42 = vld [vmem:[%s4941_s7 + $0x3b8] sm:$0xff]  ;;  %v408_v44 = vld [vmem:[%s4939_s5 + $0x570] sm:$0xff]  ;;  %v1017_v45 = vld [vmem:[%s4941_s7 + $0x380] sm:$0xff] }
 0x151   :  { %793 = vmatpush.msra.mxu0 %v407_v46  ;;  %772 = vmatpush.msra.mxu3 %v332_v47  ;;  %v1011_v46 = vld [vmem:[%s4941_s7 + $0x350] sm:$0xff]  ;;  %v403_v47 = vld [vmem:[%s4939_s5 + $0x548] sm:$0xff] }
 0x152   :  { %835 = vmatpush.msra.mxu1 %v238_v48  ;;  %852 = vmatpush.msra.mxu2 %v333_v49  ;;  %v947_v48 = vld [vmem:[%s4941_s7 + $0x150] sm:$0xff]  ;;  %v1178_v49 = vld [vmem:[%s4941_s7 + $0x888] sm:$0xff] }
 0x153   :  { %794 = vmatpush.msra.mxu0 %v402_v50  ;;  %836 = vmatmul.f32.vlgmr.msra.gmra.mxu1 %v2782_v40  ;;  %v318_v40 = vld [vmem:[%s4939_s5 + $0x2a0] sm:$0xff]  ;;  %v1004_v50 = vld [vmem:[%s4941_s7 + $0x318] sm:$0xff] }
 0x154   :  { %773 = vmatpush.msra.mxu3 %v327_v51  ;;  %853 = vmatpush.msra.mxu2 %v328_v52  ;;  %v940_v51 = vld [vmem:[%s4941_s7 + $0x118] sm:$0xff]  ;;  %v398_v52 = vld [vmem:[%s4939_s5 + $0x520] sm:$0xff] }
 0x155   :  { %795 = vmatpush.msra.mxu0 %v397_v53  ;;  %1470 = vmatpush.msrb.mxu1 %v1122_v61  ;;  %v1171_v53 = vld [vmem:[%s4941_s7 + $0x850] sm:$0xff]  ;;  %v976_v61 = vld [vmem:[%s4941_s7 + $0x238] sm:$0xff] }
 0x156   :  { %774 = vmatpush.msra.mxu3 %v322_v55  ;;  %796 = vmatmul.f32.vlgmr.msra.gmra.mxu0 %v2812_v56  ;;  %v997_v55 = vld [vmem:[%s4941_s7 + $0x2e0] sm:$0xff] }
 0x157   :  { %854 = vmatpush.msra.mxu2 %v323_v57  ;;  %894 = vmatpush.msrb.mxu0 %v483_v58  ;;  %v990_v57 = vld [vmem:[%s4941_s7 + $0x2a8] sm:$0xff]  ;;  %v933_v58 = vld [vmem:[%s4941_s7 + $0xe0] sm:$0xff] }
 0x158   :  { %775 = vmatpush.msra.mxu3 %v317_v59  ;;  %1471 = vmatpush.msrb.mxu1 %v1115_v0  ;;  %v1164_v59 = vld [vmem:[%s4941_s7 + $0x818] sm:$0xff]  ;;  %v969_v0 = vld [vmem:[%s4941_s7 + $0x200] sm:$0xff] }
 0x159   :  { %855 = vmatpush.msra.mxu2 %v318_v40  ;;  %776 = vmatmul.f32.vlgmr.msra.gmra.mxu3 %v2807_v54  ;;  %v983_v40 = vld [vmem:[%s4941_s7 + $0x270] sm:$0xff] }
 0x15a   :  { %814 = vmatpush.msrb.mxu3 %v482_v60  ;;  %856 = vmatmul.f32.vlgmr.msra.gmra.mxu2 %v2807_v54  ;;  %v463_v54 = vld [vmem:[%s4939_s5 + $0x728] sm:$0xff] }
 0x15b   :  { %895 = vmatpush.msrb.mxu0 %v478_v62  ;;  %1472 = vmatpush.msrb.mxu1 %v1108_v2  ;;  %v926_v60 = vld [vmem:[%s4941_s7 + $0xa8] sm:$0xff]  ;;  %v919_v62 = vld [vmem:[%s4941_s7 + $0x70] sm:$0xff] }
 0x15c   :  { %815 = vmatpush.msrb.mxu3 %v477_v63  ;;  %1490 = vmatpush.msrb.mxu2 %v1234_v8  ;;  %v1150_v63 = vld [vmem:[%s4941_s7 + $0x7a8] sm:$0xff]  ;;  %v1143_v2 = vld [vmem:[%s4941_s7 + $0x770] sm:$0xff] }
 0x15d   :  { %1473 = vmatpush.msrb.mxu1 %v1101_v4  ;;  %1450 = vmatpush.msra.mxu0 %v1010_v6  ;;  %v905_v4 = vld [vmem:[%s4941_s7] sm:$0xff]  ;;  %v1123_v8 = vld [vmem:[%s4941_s7 + $0x6d0] sm:$0xff] }
 0x15e   :  { %860 = vmatpush.msra.mxu3 %v473_v1  ;;  %2214 = vmatmul.msk.f32.vlgmr.msrb.gmra.mxu0 %vm496_vm4, %v2787_v43  ;;  %v912_v1 = vld [vmem:[%s4941_s7 + $0x38] sm:$0xff]  ;;  %v1129_v6 = vld [vmem:[%s4941_s7 + $0x700] sm:$0xff] }
 0x15f   :  { %1474 = vmatpush.msrb.mxu1 %v1094_v5  ;;  %1451 = vmatpush.msra.mxu0 %v1003_v7  ;;  %v955_v5 = vld [vmem:[%s4941_s7 + $0x190] sm:$0xff]  ;;  %v948_v7 = vld [vmem:[%s4941_s7 + $0x158] sm:$0xff] }
 0x160   :  { %861 = vmatpush.msra.mxu3 %v468_v3  ;;  %1491 = vmatpush.msrb.mxu2 %v1227_v12  ;;  %v962_v3 = vld [vmem:[%s4941_s7 + $0x1c8] sm:$0xff]  ;;  %v1339_v12 = vld [vmem:[%s4941_s7 + $0xd90] sm:$0xff] }
 0x161   :  { %2213 = vmatmul.msk.f32.vlgmr.msrb.gmra.mxu3 %vm496_vm4, %v2787_v43  ;;  %1475 = vmatpush.msrb.mxu1 %v1087_v10  ;;  %v448_v43 = vld [vmem:[%s4939_s5 + $0x6b0] sm:$0xff]  ;;  %v941_v10 = vld [vmem:[%s4941_s7 + $0x120] sm:$0xff] }
 0x162   :  { %862 = vmatpush.msra.mxu3 %v463_v54  ;;  %1452 = vmatpush.msra.mxu0 %v996_v11  ;;  %v1136_v54 = vld [vmem:[%s4941_s7 + $0x738] sm:$0xff] }
 0x163   :  { %1476 = vmatpush.msrb.mxu1 %v1080_v14  ;;  %1492 = vmatpush.msrb.mxu2 %v1220_v16  ;;  %v1116_v11 = vld [vmem:[%s4941_s7 + $0x698] sm:$0xff]  ;;  %v934_v14 = vld [vmem:[%s4941_s7 + $0xe8] sm:$0xff]  ;;  %v927_v16 = vld [vmem:[%s4941_s7 + $0xb0] sm:$0xff] }
 0x164   :  { %863 = vmatpush.msra.mxu3 %v458_v9  ;;  %1453 = vmatpush.msra.mxu0 %v989_v15  ;;  %v1346_v9 = vld [vmem:[%s4941_s7 + $0xdc8] sm:$0xff]  ;;  %v1109_v15 = vld [vmem:[%s4941_s7 + $0x660] sm:$0xff] }
 0x165   :  { %1477 = vmatpush.msrb.mxu1 %v1073_v17  ;;  %1493 = vmatpush.msrb.mxu2 %v1213_v19  ;;  %v3472_v17 = vld [vmem:[%s4940_s6] sm:$0x1f] }
 0x166   :  { %864 = vmatpush.msra.mxu3 %v453_v13  ;;  %1454 = vmatpush.msra.mxu0 %v982_v18  ;;  %v1332_v13 = vld [vmem:[%s4941_s7 + $0xd58] sm:$0xff]  ;;  %v1325_v18 = vld [vmem:[%s4941_s7 + $0xd20] sm:$0xff] }
 0x167   :  { %1478 = vmatpush.msrb.mxu1 %v1066_v21  ;;  %1494 = vmatpush.msrb.mxu2 %v1206_v28  ;;  %v1095_v21 = vld [vmem:[%s4941_s7 + $0x5f0] sm:$0xff]  ;;  %v1304_v28 = vld [vmem:[%s4941_s7 + $0xc78] sm:$0xff] }
 0x168   :  { %865 = vmatpush.msra.mxu3 %v448_v43  ;;  %1455 = vmatpush.msra.mxu0 %v975_v27  ;;  %v1102_v43 = vld [vmem:[%s4941_s7 + $0x628] sm:$0xff] }
 0x169   :  { %1479 = vmatpush.msrb.mxu1 %v1059_v23  ;;  %1495 = vmatpush.msrb.mxu2 %v1199_v31  ;;  %v1311_v23 = vld [vmem:[%s4941_s7 + $0xcb0] sm:$0xff] }
 0x16a   :  { %866 = vmatpush.msra.mxu3 %v443_v20  ;;  %1456 = vmatpush.msra.mxu0 %v968_v30  ;;  %v920_v20 = vld [vmem:[%s4941_s7 + $0x78] sm:$0xff]  ;;  %v1081_v30 = vld [vmem:[%s4941_s7 + $0x580] sm:$0xff] }
 0x16b   :  { %1480 = vmatpush.msrb.mxu1 %v1052_v25  ;;  %1496 = vmatpush.msrb.mxu2 %v1192_v33  ;;  %v913_v25 = vld [vmem:[%s4941_s7 + $0x40] sm:$0xff] }
 0x16c   :  { %867 = vmatpush.msra.mxu3 %v438_v22  ;;  %1457 = vmatpush.msra.mxu0 %v961_v32  ;;  %v1318_v22 = vld [vmem:[%s4941_s7 + $0xce8] sm:$0xff] }
 0x16d   :  { %1481 = vmatpush.msrb.mxu1 %v1045_v29  ;;  %1497 = vmatpush.msrb.mxu2 %v1185_v37  ;;  %v906_v29 = vld [vmem:[%s4941_s7 + $0x8] sm:$0xff]  ;;  %v1297_v37 = vld [vmem:[%s4941_s7 + $0xc40] sm:$0xff] }
 0x16e   :  { %868 = vmatpush.msra.mxu3 %v433_v24  ;;  %1458 = vmatpush.msra.mxu0 %v954_v36  ;;  %v486_v24 = vperm.slane %v3472_v17, 0  ;;  %v1074_v32 = vld [vmem:[%s4941_s7 + $0x548] sm:$0xff] }
 0x16f   :  { %1482 = vmatpush.msrb.mxu1 %v1038_v35  ;;  %1498 = vmatpush.msrb.mxu2 %v1178_v49  ;;  %v487_v35 = vperm.slane %v3472_v17, 1  ;;  %v1053_v49 = vld [vmem:[%s4941_s7 + $0x4a0] sm:$0xff] }
 0x170   :  { %869 = vmatpush.msra.mxu3 %v428_v26  ;;  %1459 = vmatpush.msra.mxu0 %v947_v48  ;;  %v1088_v26 = vld [vmem:[%s4941_s7 + $0x5b8] sm:$0xff]  ;;  %v1283_v48 = vld [vmem:[%s4941_s7 + $0xbd0] sm:$0xff] }
 0x171   :  { %1483 = vmatpush.msrb.mxu1 %v1031_v39  ;;  %1499 = vmatpush.msrb.mxu2 %v1171_v53  ;;  %v1290_v39 = vld [vmem:[%s4941_s7 + $0xc08] sm:$0xff] }
 0x172   :  { %870 = vmatpush.msra.mxu3 %v423_v34  ;;  %1460 = vmatpush.msra.mxu0 %v940_v51  ;;  %v1276_v51 = vld [vmem:[%s4941_s7 + $0xb98] sm:$0xff] }
 0x173   :  { %1484 = vmatpush.msrb.mxu1 %v1024_v42  ;;  %1500 = vmatpush.msrb.mxu2 %v1164_v59 }
 0x174   :  { %871 = vmatpush.msra.mxu3 %v418_v38  ;;  %1461 = vmatpush.msra.mxu0 %v933_v58  ;;  %v1067_v38 = vld [vmem:[%s4941_s7 + $0x510] sm:$0xff] }
 0x175   :  { %1485 = vmatpush.msrb.mxu1 %v1017_v45  ;;  %v1039_v58 = vld [vmem:[%s4941_s7 + $0x430] sm:$0xff] }
 0x176   :  { %872 = vmatpush.msra.mxu3 %v413_v41  ;;  %1462 = vmatpush.msra.mxu0 %v926_v60  ;;  %v1262_v60 = vld [vmem:[%s4941_s7 + $0xb28] sm:$0xff] }
 0x177   :  { %1550 = vmatpush.msra.mxu1 %v1011_v46 }
 0x178   :  { %873 = vmatpush.msra.mxu3 %v408_v44  ;;  %1463 = vmatpush.msra.mxu0 %v919_v62  ;;  %v1060_v44 = vld [vmem:[%s4941_s7 + $0x4d8] sm:$0xff]  ;;  %v1255_v62 = vld [vmem:[%s4941_s7 + $0xaf0] sm:$0xff] }
 0x179   :  { %1551 = vmatpush.msra.mxu1 %v1004_v50 }
 0x17a   :  { %874 = vmatpush.msra.mxu3 %v403_v47  ;;  %1464 = vmatpush.msra.mxu0 %v912_v1 }
 0x17b   :  { %1552 = vmatpush.msra.mxu1 %v997_v55 }
 0x17c   :  { %875 = vmatpush.msra.mxu3 %v398_v52  ;;  %1465 = vmatpush.msra.mxu0 %v905_v4  ;;  %v1046_v52 = vld [vmem:[%s4941_s7 + $0x468] sm:$0xff]  ;;  %v1235_v4 = vld [vmem:[%s4941_s7 + $0xa50] sm:$0xff] }
 0x17d   :  { %876 = vmatmul.f32.vlgmr.msra.gmra.mxu3 %v2812_v56  ;;  %1553 = vmatpush.msra.mxu1 %v990_v57  ;;  %v1157_v56 = vld [vmem:[%s4941_s7 + $0x7e0] sm:$0xff] }
 0x17e   :  { %1501 = vmatpush.msrb.mxu2 %v1157_v56  ;;  %1510 = vmatpush.msrb.mxu3 %v1346_v9  ;;  %v1269_v57 = vld [vmem:[%s4941_s7 + $0xb60] sm:$0xff]  ;;  %v1032_v56 = vld [vmem:[%s4941_s7 + $0x3f8] sm:$0xff]  ;;  %v1207_v9 = vld [vmem:[%s4941_s7 + $0x970] sm:$0xff] }
 0x17f   :  { %1554 = vmatpush.msra.mxu1 %v983_v40 }
 0x180   :  { %1502 = vmatpush.msrb.mxu2 %v1150_v63  ;;  %1511 = vmatpush.msrb.mxu3 %v1339_v12  ;;  %v1025_v63 = vld [vmem:[%s4941_s7 + $0x3c0] sm:$0xff]  ;;  %v1200_v12 = vld [vmem:[%s4941_s7 + $0x938] sm:$0xff] }
 0x181   :  { %1555 = vmatpush.msra.mxu1 %v976_v61 }
 0x182   :  { %1503 = vmatpush.msrb.mxu2 %v1143_v2  ;;  %1512 = vmatpush.msrb.mxu3 %v1332_v13  ;;  %v1018_v2 = vld [vmem:[%s4941_s7 + $0x388] sm:$0xff]  ;;  %v1409_v13 = vld [vmem:[%s4941_s7 + $0xfc0] sm:$0xff] }
 0x183   :  { %1556 = vmatpush.msra.mxu1 %v969_v0  ;;  %v1248_v0 = vld [vmem:[%s4941_s7 + $0xab8] sm:$0xff] }
 0x184   :  { %1504 = vmatpush.msrb.mxu2 %v1136_v54  ;;  %1513 = vmatpush.msrb.mxu3 %v1325_v18  ;;  %v1228_v54 = vld [vmem:[%s4941_s7 + $0xa18] sm:$0xff]  ;;  %v1186_v18 = vld [vmem:[%s4941_s7 + $0x8c8] sm:$0xff] }
 0x185   :  { %1557 = vmatpush.msra.mxu1 %v962_v3  ;;  %v1241_v3 = vld [vmem:[%s4941_s7 + $0xa80] sm:$0xff] }
 0x186   :  { %1505 = vmatpush.msrb.mxu2 %v1129_v6  ;;  %1514 = vmatpush.msrb.mxu3 %v1318_v22  ;;  %v1214_v6 = vld [vmem:[%s4941_s7 + $0x9a8] sm:$0xff]  ;;  %v488_v22 = vperm.slane %v3472_v17, 2 }
 0x187   :  { %1558 = vmatpush.msra.mxu1 %v955_v5  ;;  %v1221_v5 = vld [vmem:[%s4941_s7 + $0x9e0] sm:$0xff] }
 0x188   :  { %1570 = vmatpush.msra.mxu2 %v1123_v8  ;;  %1515 = vmatpush.msrb.mxu3 %v1311_v23  ;;  %v1424_v8 = vld [vmem:[%s4941_s7 + $0x1038] sm:$0xff]  ;;  %v1179_v23 = vld [vmem:[%s4941_s7 + $0x890] sm:$0xff] }
 0x189   :  { %1559 = vmatpush.msra.mxu1 %v948_v7  ;;  %v1423_v7 = vld [vmem:[%s4941_s7 + $0x1030] sm:$0xff] }
 0x18a   :  { %1571 = vmatpush.msra.mxu2 %v1116_v11  ;;  %v517_v27 = vpop.f32.mrf.mxu1  ;;  %1516 = vmatpush.msrb.mxu3 %v1304_v28  ;;  %v1417_v11 = vld [vmem:[%s4941_s7 + $0x1000] sm:$0xff]  ;;  %v1172_v28 = vld [vmem:[%s4941_s7 + $0x858] sm:$0xff] }
 0x18b   :  { %1560 = vmatpush.msra.mxu1 %v941_v10  ;;  %v577_v19 = vpop.f32.mrf.mxu0  ;;  %v518_v31 = vadd.f32 %v517_v27, %v486_v24  ;;  %1535 = vmatpush.msrb.mxu0 %v1423_v7  ;;  %v1416_v10 = vld [vmem:[%s4941_s7 + $0xff8] sm:$0xff] }
 0x18c   :  { %1572 = vmatpush.msra.mxu2 %v1109_v15  ;;  %1517 = vmatpush.msrb.mxu3 %v1297_v37  ;;  %v1193_v15 = vld [vmem:[%s4941_s7 + $0x900] sm:$0xff]  ;;  %v1312_v7 = vld [vmem:[%s4941_s7 + $0xcb8] sm:$0xff] }
 0x18d   :  { %1561 = vmatpush.msra.mxu1 %v934_v14  ;;  %1536 = vmatpush.msrb.mxu0 %v1416_v10  ;;  %v1410_v14 = vld [vmem:[%s4941_s7 + $0xfc8] sm:$0xff]  ;;  %v1305_v10 = vld [vmem:[%s4941_s7 + $0xc80] sm:$0xff] }
 0x18e   :  { %1573 = vmatpush.msra.mxu2 %v1102_v43  ;;  %1518 = vmatpush.msrb.mxu3 %v1290_v39  ;;  %v1403_v43 = vld [vmem:[%s4941_s7 + $0xf90] sm:$0xff]  ;;  %v1368_v39 = vld [vmem:[%s4941_s7 + $0xe78] sm:$0xff] }
 0x18f   :  { %1562 = vmatpush.msra.mxu1 %v927_v16  ;;  %v1402_v16 = vld [vmem:[%s4941_s7 + $0xf88] sm:$0xff]  ;;  %1537 = vmatpush.msrb.mxu0 %v1409_v13 }
 0x190   :  { %1574 = vmatpush.msra.mxu2 %v1095_v21  ;;  %1519 = vmatpush.msrb.mxu3 %v1283_v48  ;;  %v1396_v21 = vld [vmem:[%s4941_s7 + $0xf58] sm:$0xff]  ;;  %v1298_v13 = vld [vmem:[%s4941_s7 + $0xc48] sm:$0xff] }
 0x191   :  { %1563 = vmatpush.msra.mxu1 %v920_v20  ;;  %v1395_v20 = vld [vmem:[%s4941_s7 + $0xf50] sm:$0xff]  ;;  %1538 = vmatpush.msrb.mxu0 %v1402_v16 }
 0x192   :  { %1575 = vmatpush.msra.mxu2 %v1088_v26  ;;  %1520 = vmatpush.msrb.mxu3 %v1276_v51  ;;  %v1389_v26 = vld [vmem:[%s4941_s7 + $0xf20] sm:$0xff]  ;;  %v1291_v16 = vld [vmem:[%s4941_s7 + $0xc10] sm:$0xff] }
 0x193   :  { %1564 = vmatpush.msra.mxu1 %v913_v25  ;;  %v597_v41 = vpop.f32.mrf.mxu0  ;;  %1539 = vmatpush.msrb.mxu0 %v1395_v20  ;;  %v1388_v25 = vld [vmem:[%s4941_s7 + $0xf18] sm:$0xff]  ;;  %v1353_v51 = vld [vmem:[%s4941_s7 + $0xe00] sm:$0xff] }
 0x194   :  { %1576 = vmatpush.msra.mxu2 %v1081_v30  ;;  %v598_v46 = vadd.f32 %v597_v41, %v487_v35  ;;  %v617_v50 = vpop.f32.mrf.mxu1  ;;  %1521 = vmatpush.msrb.mxu3 %v1269_v57  ;;  %v1382_v30 = vld [vmem:[%s4941_s7 + $0xee8] sm:$0xff]  ;;  %v1375_v35 = vld [vmem:[%s4941_s7 + $0xeb0] sm:$0xff]  ;;  %v1285_v20 = vld [vmem:[%s4941_s7 + $0xbe0] sm:$0xff] }
 0x195   :  { %1565 = vmatpush.msra.mxu1 %v906_v29  ;;  %1540 = vmatpush.msrb.mxu0 %v1388_v25  ;;  %v1381_v29 = vld [vmem:[%s4941_s7 + $0xee0] sm:$0xff]  ;;  %v1151_v41 = vld [vmem:[%s4941_s7 + $0x7b0] sm:$0xff]  ;;  %v1278_v25 = vld [vmem:[%s4941_s7 + $0xba8] sm:$0xff] }
 0x196   :  { %v537_v33 = vpop.f32.mrf.mxu2  ;;  %1577 = vmatpush.msra.mxu2 %v1074_v32  ;;  %v618_v53 = vadd.f32 %v617_v50, %v598_v46  ;;  %1522 = vmatpush.msrb.mxu3 %v1262_v60  ;;  %v1165_v32 = vld [vmem:[%s4941_s7 + $0x820] sm:$0xff]  ;;  %v1144_v50 = vld [vmem:[%s4941_s7 + $0x778] sm:$0xff]  ;;  %v1347_v57 = vld [vmem:[%s4941_s7 + $0xdd0] sm:$0xff] }
 0x197   :  { %v538_v34 = vadd.f32 %v537_v33, %v518_v31  ;;  %v557_v36 = vpop.f32.mrf.mxu3  ;;  %1541 = vmatpush.msrb.mxu0 %v1381_v29  ;;  %v1374_v33 = vld [vmem:[%s4941_s7 + $0xea8] sm:$0xff]  ;;  %v1340_v60 = vld [vmem:[%s4941_s7 + $0xd98] sm:$0xff]  ;;  %v1271_v29 = vld [vmem:[%s4941_s7 + $0xb70] sm:$0xff] }
 0x198   :  { %1578 = vmatpush.msra.mxu2 %v1067_v38  ;;  %1523 = vmatpush.msrb.mxu3 %v1255_v62  ;;  %v1367_v38 = vld [vmem:[%s4941_s7 + $0xe70] sm:$0xff]  ;;  %v1333_v62 = vld [vmem:[%s4941_s7 + $0xd60] sm:$0xff] }
 0x199   :  { %v558_v42 = vadd.f32 %v557_v36, %v538_v34  ;;  %v1158_v36 = vld [vmem:[%s4941_s7 + $0x7e8] sm:$0xff]  ;;  %1542 = vmatpush.msrb.mxu0 %v1374_v33  ;;  %v1264_v33 = vld [vmem:[%s4941_s7 + $0xb38] sm:$0xff] }
 0x19a   :  { %1579 = vmatpush.msra.mxu2 %v1060_v44  ;;  %1524 = vmatpush.msrb.mxu3 %v1248_v0  ;;  %v1360_v44 = vld [vmem:[%s4941_s7 + $0xe38] sm:$0xff] }
 0x19b   :  { %v578_v45 = vadd.f32 %v577_v19, %v558_v42  ;;  %1543 = vmatpush.msrb.mxu0 %v1367_v38  ;;  %v984_v0 = vld [vmem:[%s4941_s7 + $0x278] sm:$0xff]  ;;  %v907_v38 = vld [vmem:[%s4941_s7 + $0x10] sm:$0xff] }
 0x19c   :  { %1580 = vmatpush.msra.mxu2 %v1053_v49  ;;  %1525 = vmatpush.msrb.mxu3 %v1241_v3  ;;  %v1012_v49 = vld [vmem:[%s4941_s7 + $0x358] sm:$0xff]  ;;  %v1327_v3 = vld [vmem:[%s4941_s7 + $0xd30] sm:$0xff] }
 0x19d   :  { %v3521_v47 = vmax.f32 %v578_v45, 0.0  ;;  %v1361_v45 = vld [vmem:[%s4941_s7 + $0xe40] sm:$0xff]  ;;  %1544 = vmatpush.msrb.mxu0 %v1360_v44 }
 0x19e   :  { %1581 = vmatpush.msra.mxu2 %v1046_v52  ;;  %1590 = vmatpush.msra.mxu3 %v1235_v4  ;;  %v1354_v52 = vld [vmem:[%s4941_s7 + $0xe08] sm:$0xff]  ;;  %v977_v4 = vld [vmem:[%s4941_s7 + $0x240] sm:$0xff] }
 0x19f   :  { %1466 = vmatmul.f32.vlgmr.msra.gmra.mxu0 %v3521_v47 }
 0x1a0   :  { %1582 = vmatpush.msra.mxu2 %v1039_v58  ;;  %v657_v40 = vpop.f32.mrf.mxu3  ;;  %1591 = vmatpush.msra.mxu3 %v1228_v54  ;;  %v998_v58 = vld [vmem:[%s4941_s7 + $0x2e8] sm:$0xff]  ;;  %v1319_v54 = vld [vmem:[%s4941_s7 + $0xcf0] sm:$0xff] }
 0x1a1   :  { %v637_v55 = vpop.f32.mrf.mxu2  ;;  %1545 = vmatpush.msrb.mxu0 %v1353_v51 }
 0x1a2   :  { %v638_v59 = vadd.f32 %v637_v55, %v618_v53  ;;  %1583 = vmatpush.msra.mxu2 %v1032_v56  ;;  %1592 = vmatpush.msra.mxu3 %v1221_v5  ;;  %v1005_v53 = vld [vmem:[%s4941_s7 + $0x320] sm:$0xff]  ;;  %v1320_v5 = vld [vmem:[%s4941_s7 + $0xcf8] sm:$0xff] }
 0x1a3   :  { %v1137_v55 = vld [vmem:[%s4941_s7 + $0x740] sm:$0xff]  ;;  %1610 = vmatpush.msra.mxu0 %v1347_v57  ;;  %v1411_v57 = vld [vmem:[%s4941_s7 + $0xfd0] sm:$0xff] }
 0x1a4   :  { %v658_v61 = vadd.f32 %v657_v40, %v638_v59  ;;  %1584 = vmatpush.msra.mxu2 %v1025_v63  ;;  %1593 = vmatpush.msra.mxu3 %v1214_v6  ;;  %v1348_v59 = vld [vmem:[%s4941_s7 + $0xdd8] sm:$0xff]  ;;  %v1130_v40 = vld [vmem:[%s4941_s7 + $0x708] sm:$0xff]  ;;  %v1341_v56 = vld [vmem:[%s4941_s7 + $0xda0] sm:$0xff] }
 0x1a5   :  { %1611 = vmatpush.msra.mxu0 %v1340_v60  ;;  %v1334_v63 = vld [vmem:[%s4941_s7 + $0xd68] sm:$0xff]  ;;  %v1397_v60 = vld [vmem:[%s4941_s7 + $0xf60] sm:$0xff] }
 0x1a6   :  { %v3557_v1 = vmax.f32 %v658_v61, 0.0  ;;  %1585 = vmatpush.msra.mxu2 %v1018_v2  ;;  %1594 = vmatpush.msra.mxu3 %v1207_v9  ;;  %v991_v61 = vld [vmem:[%s4941_s7 + $0x2b0] sm:$0xff]  ;;  %v1326_v2 = vld [vmem:[%s4941_s7 + $0xd28] sm:$0xff] }
 0x1a7   :  { %1612 = vmatpush.msra.mxu0 %v1333_v62  ;;  %v970_v6 = vld [vmem:[%s4941_s7 + $0x208] sm:$0xff]  ;;  %v963_v9 = vld [vmem:[%s4941_s7 + $0x1d0] sm:$0xff]  ;;  %v1096_v62 = vld [vmem:[%s4941_s7 + $0x5f8] sm:$0xff] }
 0x1a8   :  { %1486 = vmatmul.f32.vlgmr.msrb.gmra.mxu1 %v3557_v1  ;;  %1595 = vmatpush.msra.mxu3 %v1200_v12  ;;  %v956_v12 = vld [vmem:[%s4941_s7 + $0x198] sm:$0xff] }
 0x1a9   :  { %1635 = vmatpush.msrb.mxu1 %v1424_v8  ;;  %1613 = vmatpush.msra.mxu0 %v1326_v2  ;;  %v1313_v8 = vld [vmem:[%s4941_s7 + $0xcc0] sm:$0xff]  ;;  %v1376_v2 = vld [vmem:[%s4941_s7 + $0xeb8] sm:$0xff] }
 0x1aa   :  { %1596 = vmatpush.msra.mxu3 %v1193_v15  ;;  %v949_v15 = vld [vmem:[%s4941_s7 + $0x160] sm:$0xff] }
 0x1ab   :  { %1636 = vmatpush.msrb.mxu1 %v1417_v11  ;;  %1614 = vmatpush.msra.mxu0 %v1319_v54  ;;  %v1306_v11 = vld [vmem:[%s4941_s7 + $0xc88] sm:$0xff]  ;;  %v1075_v54 = vld [vmem:[%s4941_s7 + $0x550] sm:$0xff] }
 0x1ac   :  { %1597 = vmatpush.msra.mxu3 %v1186_v18  ;;  %v942_v18 = vld [vmem:[%s4941_s7 + $0x128] sm:$0xff] }
 0x1ad   :  { %1637 = vmatpush.msrb.mxu1 %v1410_v14  ;;  %v697_v19 = vpop.f32.mrf.mxu0  ;;  %1615 = vmatpush.msra.mxu0 %v1312_v7  ;;  %v1299_v14 = vld [vmem:[%s4941_s7 + $0xc50] sm:$0xff]  ;;  %v1068_v7 = vld [vmem:[%s4941_s7 + $0x518] sm:$0xff] }
 0x1ae   :  { %1598 = vmatpush.msra.mxu3 %v1179_v23  ;;  %v717_v34 = vpop.f32.mrf.mxu1 }
 0x1af   :  { %1638 = vmatpush.msrb.mxu1 %v1403_v43  ;;  %1616 = vmatpush.msra.mxu0 %v1305_v10  ;;  %v1292_v43 = vld [vmem:[%s4941_s7 + $0xc18] sm:$0xff]  ;;  %v1349_v10 = vld [vmem:[%s4941_s7 + $0xde0] sm:$0xff] }
 0x1b0   :  { %1566 = vmatmul.f32.vlgmr.msra.gmra.mxu1 %v3521_v47  ;;  %1599 = vmatpush.msra.mxu3 %v1172_v28  ;;  %v1270_v28 = vld [vmem:[%s4941_s7 + $0xb68] sm:$0xff] }
 0x1b1   :  { %1639 = vmatpush.msrb.mxu1 %v1396_v21  ;;  %1617 = vmatpush.msra.mxu0 %v1298_v13  ;;  %v489_v21 = vperm.slane %v3472_v17, 3 }
 0x1b2   :  { %1600 = vmatpush.msra.mxu3 %v1165_v32  ;;  %v1263_v32 = vld [vmem:[%s4941_s7 + $0xb30] sm:$0xff] }
 0x1b3   :  { %1640 = vmatpush.msrb.mxu1 %v1389_v26  ;;  %1618 = vmatpush.msra.mxu0 %v1291_v16 }
 0x1b4   :  { %1601 = vmatpush.msra.mxu3 %v1158_v36  ;;  %v1256_v36 = vld [vmem:[%s4941_s7 + $0xaf8] sm:$0xff] }
 0x1b5   :  { %1641 = vmatpush.msrb.mxu1 %v1382_v30 }
 0x1b6   :  { %1602 = vmatpush.msra.mxu3 %v1151_v41  ;;  %v1249_v41 = vld [vmem:[%s4941_s7 + $0xac0] sm:$0xff] }
 0x1b7   :  { %1642 = vmatpush.msrb.mxu1 %v1375_v35  ;;  %v914_v35 = vld [vmem:[%s4941_s7 + $0x48] sm:$0xff] }
 0x1b8   :  { %v737_v42 = vpop.f32.mrf.mxu0  ;;  %1603 = vmatpush.msra.mxu3 %v1144_v50  ;;  %v1243_v50 = vld [vmem:[%s4941_s7 + $0xa90] sm:$0xff] }
 0x1b9   :  { %1643 = vmatpush.msrb.mxu1 %v1368_v39 }
 0x1ba   :  { %1604 = vmatpush.msra.mxu3 %v1137_v55  ;;  %v1124_v55 = vld [vmem:[%s4941_s7 + $0x6d8] sm:$0xff] }
 0x1bb   :  { %v677_v24 = vpop.f32.mrf.mxu3  ;;  %1644 = vmatpush.msrb.mxu1 %v1361_v45  ;;  %v757_v23 = vpop.f32.mrf.mxu2  ;;  %v1425_v45 = vld [vmem:[%s4941_s7 + $0x1040] sm:$0xff] }
 0x1bc   :  { %v678_v27 = vadd.f32 %v677_v24, %v488_v22  ;;  %1605 = vmatpush.msra.mxu3 %v1130_v40  ;;  %v935_v22 = vld [vmem:[%s4941_s7 + $0xf0] sm:$0xff]  ;;  %v1277_v24 = vld [vmem:[%s4941_s7 + $0xba0] sm:$0xff]  ;;  %v758_v30 = vadd.f32 %v757_v23, %v489_v21  ;;  %v1110_v40 = vld [vmem:[%s4941_s7 + $0x668] sm:$0xff] }
 0x1bd   :  { %1645 = vmatpush.msrb.mxu1 %v1354_v52  ;;  %v1418_v52 = vld [vmem:[%s4941_s7 + $0x1008] sm:$0xff]  ;;  %v1040_v21 = vld [vmem:[%s4941_s7 + $0x438] sm:$0xff]  ;;  %v1321_v23 = vld [vmem:[%s4941_s7 + $0xd00] sm:$0xff] }
 0x1be   :  { %v698_v31 = vadd.f32 %v697_v19, %v678_v27  ;;  %v1284_v19 = vld [vmem:[%s4941_s7 + $0xbd8] sm:$0xff] }
 0x1bf   :  { %1710 = vmatpush.msra.mxu1 %v1348_v59  ;;  %1619 = vmatpush.msra.mxu0 %v1284_v19  ;;  %v928_v27 = vld [vmem:[%s4941_s7 + $0xb8] sm:$0xff] }
 0x1c0   :  { %v718_v37 = vadd.f32 %v717_v34, %v698_v31  ;;  %v921_v31 = vld [vmem:[%s4941_s7 + $0x80] sm:$0xff]  ;;  %v1404_v59 = vld [vmem:[%s4941_s7 + $0xf98] sm:$0xff] }
 0x1c1   :  { %1711 = vmatpush.msra.mxu1 %v1341_v56  ;;  %1620 = vmatpush.msra.mxu0 %v1277_v24  ;;  %v1103_v56 = vld [vmem:[%s4941_s7 + $0x630] sm:$0xff]  ;;  %v1328_v19 = vld [vmem:[%s4941_s7 + $0xd38] sm:$0xff] }
 0x1c2   :  { %v738_v46 = vadd.f32 %v737_v42, %v718_v37  ;;  %v1257_v37 = vld [vmem:[%s4941_s7 + $0xb00] sm:$0xff]  ;;  %v1250_v42 = vld [vmem:[%s4941_s7 + $0xac8] sm:$0xff] }
 0x1c3   :  { %1712 = vmatpush.msra.mxu1 %v1334_v63  ;;  %1621 = vmatpush.msra.mxu0 %v1270_v28  ;;  %v1383_v63 = vld [vmem:[%s4941_s7 + $0xef0] sm:$0xff]  ;;  %v1236_v28 = vld [vmem:[%s4941_s7 + $0xa58] sm:$0xff] }
 0x1c4   :  { %v3667_v48 = vmax.f32 %v738_v46, 0.0 }
 0x1c5   :  { %1713 = vmatpush.msra.mxu1 %v1327_v3  ;;  %1622 = vmatpush.msra.mxu0 %v1263_v32  ;;  %v1082_v3 = vld [vmem:[%s4941_s7 + $0x588] sm:$0xff]  ;;  %v1229_v32 = vld [vmem:[%s4941_s7 + $0xa20] sm:$0xff] }
 0x1c6   :  { %1506 = vmatmul.f32.vlgmr.msrb.gmra.mxu2 %v3667_v48 }
 0x1c7   :  { %1650 = vmatpush.msrb.mxu2 %v1012_v49  ;;  %1714 = vmatpush.msra.mxu1 %v1320_v5  ;;  %v1242_v49 = vld [vmem:[%s4941_s7 + $0xa88] sm:$0xff] }
 0x1c8   :  { %1623 = vmatpush.msra.mxu0 %v1256_v36  ;;  %v1362_v5 = vld [vmem:[%s4941_s7 + $0xe48] sm:$0xff] }
 0x1c9   :  { %1651 = vmatpush.msrb.mxu2 %v1005_v53  ;;  %1715 = vmatpush.msra.mxu1 %v1313_v8  ;;  %v1355_v8 = vld [vmem:[%s4941_s7 + $0xe10] sm:$0xff]  ;;  %v1222_v36 = vld [vmem:[%s4941_s7 + $0x9e8] sm:$0xff] }
 0x1ca   :  { %1624 = vmatpush.msra.mxu0 %v1249_v41  ;;  %v1215_v41 = vld [vmem:[%s4941_s7 + $0x9b0] sm:$0xff] }
 0x1cb   :  { %1652 = vmatpush.msrb.mxu2 %v998_v58  ;;  %1716 = vmatpush.msra.mxu1 %v1306_v11  ;;  %v1117_v58 = vld [vmem:[%s4941_s7 + $0x6a0] sm:$0xff] }
 0x1cc   :  { %1625 = vmatpush.msra.mxu0 %v1242_v49  ;;  %v1061_v11 = vld [vmem:[%s4941_s7 + $0x4e0] sm:$0xff] }
 0x1cd   :  { %1653 = vmatpush.msrb.mxu2 %v991_v61  ;;  %1717 = vmatpush.msra.mxu1 %v1299_v14  ;;  %v1390_v61 = vld [vmem:[%s4941_s7 + $0xf28] sm:$0xff]  ;;  %v1209_v49 = vld [vmem:[%s4941_s7 + $0x980] sm:$0xff] }
 0x1ce   :  { %1586 = vmatmul.f32.vlgmr.msra.gmra.mxu2 %v3557_v1  ;;  %v1054_v14 = vld [vmem:[%s4941_s7 + $0x4a8] sm:$0xff] }
 0x1cf   :  { %1654 = vmatpush.msrb.mxu2 %v984_v0  ;;  %1718 = vmatpush.msra.mxu1 %v1292_v43  ;;  %v1089_v0 = vld [vmem:[%s4941_s7 + $0x5c0] sm:$0xff]  ;;  %v1047_v43 = vld [vmem:[%s4941_s7 + $0x470] sm:$0xff] }
 0x1d1   :  { %1655 = vmatpush.msrb.mxu2 %v977_v4  ;;  %1719 = vmatpush.msra.mxu1 %v1285_v20  ;;  %v1369_v4 = vld [vmem:[%s4941_s7 + $0xe80] sm:$0xff] }
 0x1d3   :  { %1656 = vmatpush.msrb.mxu2 %v970_v6  ;;  %1720 = vmatpush.msra.mxu1 %v1278_v25  ;;  %v797_v39 = vpop.f32.mrf.mxu0  ;;  %v490_v6 = vperm.slane %v3472_v17, 4  ;;  %v1033_v25 = vld [vmem:[%s4941_s7 + $0x400] sm:$0xff] }
 0x1d5   :  { %1657 = vmatpush.msrb.mxu2 %v963_v9  ;;  %1721 = vmatpush.msra.mxu1 %v1271_v29  ;;  %v837_v9 = vpop.f32.mrf.mxu1  ;;  %v1237_v29 = vld [vmem:[%s4941_s7 + $0xa60] sm:$0xff] }
 0x1d6   :  { %v838_v13 = vadd.f32 %v837_v9, %v490_v6  ;;  %v1174_v6 = vld [vmem:[%s4941_s7 + $0x868] sm:$0xff] }
 0x1d7   :  { %1658 = vmatpush.msrb.mxu2 %v956_v12  ;;  %1722 = vmatpush.msra.mxu1 %v1264_v33  ;;  %v1342_v12 = vld [vmem:[%s4941_s7 + $0xda8] sm:$0xff] }
 0x1d8   :  { %v1230_v33 = vld [vmem:[%s4941_s7 + $0xa28] sm:$0xff] }
 0x1d9   :  { %1659 = vmatpush.msrb.mxu2 %v949_v15  ;;  %1723 = vmatpush.msra.mxu1 %v1257_v37  ;;  %v1335_v15 = vld [vmem:[%s4941_s7 + $0xd70] sm:$0xff]  ;;  %v1166_v9 = vld [vmem:[%s4941_s7 + $0x828] sm:$0xff] }
 0x1da   :  { %v1223_v37 = vld [vmem:[%s4941_s7 + $0x9f0] sm:$0xff] }
 0x1db   :  { %1660 = vmatpush.msrb.mxu2 %v942_v18  ;;  %1724 = vmatpush.msra.mxu1 %v1250_v42  ;;  %v1216_v42 = vld [vmem:[%s4941_s7 + $0x9b8] sm:$0xff] }
 0x1dc   :  { %v777_v26 = vpop.f32.mrf.mxu3 }
 0x1dd   :  { %1661 = vmatpush.msrb.mxu2 %v935_v22  ;;  %v778_v34 = vadd.f32 %v777_v26, %v758_v30  ;;  %1725 = vmatpush.msra.mxu1 %v1243_v50  ;;  %v857_v17 = vpop.f32.mrf.mxu2  ;;  %v897_v22 = vpop.f32.mrf.mxu0  ;;  %v1314_v30 = vld [vmem:[%s4941_s7 + $0xcc8] sm:$0xff]  ;;  %v992_v50 = vld [vmem:[%s4941_s7 + $0x2b8] sm:$0xff] }
 0x1de   :  { %v858_v16 = vadd.f32 %v857_v17, %v838_v13  ;;  %v1244_v17 = vld [vmem:[%s4941_s7 + $0xa98] sm:$0xff] }
 0x1df   :  { %1662 = vmatpush.msrb.mxu2 %v928_v27  ;;  %v798_v44 = vadd.f32 %v797_v39, %v778_v34  ;;  %v1026_v27 = vld [vmem:[%s4941_s7 + $0x3c8] sm:$0xff]  ;;  %v1307_v34 = vld [vmem:[%s4941_s7 + $0xc90] sm:$0xff]  ;;  %v1160_v13 = vld [vmem:[%s4941_s7 + $0x7f8] sm:$0xff] }
 0x1e0   :  { %v1006_v39 = vld [vmem:[%s4941_s7 + $0x328] sm:$0xff] }
 0x1e1   :  { %1663 = vmatpush.msrb.mxu2 %v921_v31  ;;  %v1019_v31 = vld [vmem:[%s4941_s7 + $0x390] sm:$0xff] }
 0x1e3   :  { %1664 = vmatpush.msrb.mxu2 %v914_v35  ;;  %v1013_v35 = vld [vmem:[%s4941_s7 + $0x360] sm:$0xff] }
 0x1e4   :  { %v817_v46 = vpop.f32.mrf.mxu3 }
 0x1e5   :  { %1665 = vmatpush.msrb.mxu2 %v907_v38  ;;  %v818_v51 = vadd.f32 %v817_v46, %v798_v44  ;;  %v1300_v38 = vld [vmem:[%s4941_s7 + $0xc58] sm:$0xff]  ;;  %v1293_v44 = vld [vmem:[%s4941_s7 + $0xc20] sm:$0xff] }
 0x1e6   :  { %1666 = vmatmul.f32.vlgmr.msrb.gmra.mxu2 %v3521_v47  ;;  %v1208_v46 = vld [vmem:[%s4941_s7 + $0x978] sm:$0xff] }
 0x1e7   :  { %1735 = vmatpush.msra.mxu2 %v1425_v45  ;;  %v3838_v53 = vmax.f32 %v818_v51, 0.0  ;;  %v999_v45 = vld [vmem:[%s4941_s7 + $0x2f0] sm:$0xff]  ;;  %v1286_v51 = vld [vmem:[%s4941_s7 + $0xbe8] sm:$0xff] }
 0x1e9   :  { %1736 = vmatpush.msra.mxu2 %v1418_v52  ;;  %1526 = vmatmul.f32.vlgmr.msrb.gmra.mxu3 %v3838_v53  ;;  %v1201_v52 = vld [vmem:[%s4941_s7 + $0x940] sm:$0xff] }
 0x1ea   :  { %1670 = vmatpush.msrb.mxu3 %v1124_v55  ;;  %v1202_v55 = vld [vmem:[%s4941_s7 + $0x948] sm:$0xff] }
 0x1eb   :  { %1737 = vmatpush.msra.mxu2 %v1411_v57  ;;  %v985_v57 = vld [vmem:[%s4941_s7 + $0x280] sm:$0xff] }
 0x1ec   :  { %1671 = vmatpush.msrb.mxu3 %v1117_v58  ;;  %v1279_v58 = vld [vmem:[%s4941_s7 + $0xbb0] sm:$0xff] }
 0x1ed   :  { %1738 = vmatpush.msra.mxu2 %v1404_v59  ;;  %v1194_v59 = vld [vmem:[%s4941_s7 + $0x908] sm:$0xff] }
 0x1ee   :  { %1672 = vmatpush.msrb.mxu3 %v1110_v40  ;;  %v1195_v40 = vld [vmem:[%s4941_s7 + $0x910] sm:$0xff] }
 0x1ef   :  { %1739 = vmatpush.msra.mxu2 %v1397_v60  ;;  %v978_v60 = vld [vmem:[%s4941_s7 + $0x248] sm:$0xff] }
 0x1f0   :  { %1673 = vmatpush.msrb.mxu3 %v1103_v56  ;;  %v1272_v56 = vld [vmem:[%s4941_s7 + $0xb78] sm:$0xff] }
 0x1f1   :  { %1740 = vmatpush.msra.mxu2 %v1390_v61  ;;  %1606 = vmatmul.f32.vlgmr.msra.gmra.mxu3 %v3667_v48  ;;  %v1187_v61 = vld [vmem:[%s4941_s7 + $0x8d0] sm:$0xff] }
 0x1f2   :  { %1674 = vmatpush.msrb.mxu3 %v1096_v62  ;;  %v1188_v62 = vld [vmem:[%s4941_s7 + $0x8d8] sm:$0xff] }
 0x1f3   :  { %1741 = vmatpush.msra.mxu2 %v1383_v63  ;;  %v971_v63 = vld [vmem:[%s4941_s7 + $0x210] sm:$0xff] }
 0x1f4   :  { %1675 = vmatpush.msrb.mxu3 %v1089_v0  ;;  %v1265_v0 = vld [vmem:[%s4941_s7 + $0xb40] sm:$0xff] }
 0x1f5   :  { %1742 = vmatpush.msra.mxu2 %v1376_v2  ;;  %v1180_v2 = vld [vmem:[%s4941_s7 + $0x898] sm:$0xff] }
 0x1f6   :  { %1676 = vmatpush.msrb.mxu3 %v1082_v3  ;;  %v1181_v3 = vld [vmem:[%s4941_s7 + $0x8a0] sm:$0xff] }
 0x1f7   :  { %1743 = vmatpush.msra.mxu2 %v1369_v4  ;;  %v964_v4 = vld [vmem:[%s4941_s7 + $0x1d8] sm:$0xff] }
 0x1f8   :  { %1677 = vmatpush.msrb.mxu3 %v1075_v54  ;;  %v1258_v54 = vld [vmem:[%s4941_s7 + $0xb08] sm:$0xff] }
 0x1f9   :  { %1744 = vmatpush.msra.mxu2 %v1362_v5  ;;  %v1173_v5 = vld [vmem:[%s4941_s7 + $0x860] sm:$0xff] }
 0x1fa   :  { %1678 = vmatpush.msrb.mxu3 %v1068_v7  ;;  %v957_v7 = vld [vmem:[%s4941_s7 + $0x1a0] sm:$0xff] }
 0x1fb   :  { %1745 = vmatpush.msra.mxu2 %v1355_v8  ;;  %v1251_v8 = vld [vmem:[%s4941_s7 + $0xad0] sm:$0xff] }
 0x1fc   :  { %1679 = vmatpush.msrb.mxu3 %v1061_v11  ;;  %v950_v11 = vld [vmem:[%s4941_s7 + $0x168] sm:$0xff] }
 0x1fd   :  { %1810 = vmatpush.msrb.mxu2 %v1349_v10  ;;  %v1167_v10 = vld [vmem:[%s4941_s7 + $0x830] sm:$0xff] }
 0x1fe   :  { %1680 = vmatpush.msrb.mxu3 %v1054_v14  ;;  %v1238_v14 = vld [vmem:[%s4941_s7 + $0xa68] sm:$0xff] }
 0x1ff   :  { %1811 = vmatpush.msrb.mxu2 %v1342_v12  ;;  %v1159_v12 = vld [vmem:[%s4941_s7 + $0x7f0] sm:$0xff] }
 0x200   :  { %v877_v18 = vpop.f32.mrf.mxu3  ;;  %1681 = vmatpush.msrb.mxu3 %v1047_v43  ;;  %v1153_v43 = vld [vmem:[%s4941_s7 + $0x7c0] sm:$0xff] }
 0x201   :  { %v878_v20 = vadd.f32 %v877_v18, %v858_v16  ;;  %1812 = vmatpush.msrb.mxu2 %v1335_v15  ;;  %v943_v15 = vld [vmem:[%s4941_s7 + $0x130] sm:$0xff]  ;;  %v1152_v16 = vld [vmem:[%s4941_s7 + $0x7b8] sm:$0xff] }
 0x202   :  { %1682 = vmatpush.msrb.mxu3 %v1040_v21  ;;  %v1231_v18 = vld [vmem:[%s4941_s7 + $0xa30] sm:$0xff]  ;;  %v1146_v21 = vld [vmem:[%s4941_s7 + $0x788] sm:$0xff] }
 0x203   :  { %v898_v24 = vadd.f32 %v897_v22, %v878_v20  ;;  %1813 = vmatpush.msrb.mxu2 %v1328_v19  ;;  %v936_v19 = vld [vmem:[%s4941_s7 + $0xf8] sm:$0xff]  ;;  %v1145_v20 = vld [vmem:[%s4941_s7 + $0x780] sm:$0xff] }
 0x204   :  { %1683 = vmatpush.msrb.mxu3 %v1033_v25  ;;  %v1224_v22 = vld [vmem:[%s4941_s7 + $0x9f8] sm:$0xff]  ;;  %v1139_v25 = vld [vmem:[%s4941_s7 + $0x750] sm:$0xff] }
 0x205   :  { %v3927_v26 = vmax.f32 %v898_v24, 0.0  ;;  %1814 = vmatpush.msrb.mxu2 %v1321_v23  ;;  %v929_v23 = vld [vmem:[%s4941_s7 + $0xc0] sm:$0xff]  ;;  %v1138_v24 = vld [vmem:[%s4941_s7 + $0x748] sm:$0xff] }
 0x206   :  { %1684 = vmatpush.msrb.mxu3 %v1026_v27  ;;  %v1217_v27 = vld [vmem:[%s4941_s7 + $0x9c0] sm:$0xff] }
 0x207   :  { %2215 = vmatmul.msk.f32.vlgmr.msrb.gmra.mxu0 %vm1446_vm5, %v3927_v26  ;;  %2216 = vmatmul.msk.f32.vlgmr.msrb.gmra.mxu1 %vm1446_vm5, %v3927_v26 }
 0x208   :  { %1690 = vmatpush.msrb.mxu0 %v1236_v28  ;;  %2217 = vmatmul.msk.f32.vlgmr.msra.gmra.mxu2 %vm1446_vm5, %v3927_v26  ;;  %v922_v28 = vld [vmem:[%s4941_s7 + $0x88] sm:$0xff] }
 0x209   :  { %1790 = vmatpush.msrb.mxu1 %v1237_v29  ;;  %1815 = vmatpush.msrb.mxu2 %v1314_v30  ;;  %v1131_v29 = vld [vmem:[%s4941_s7 + $0x710] sm:$0xff]  ;;  %v1132_v30 = vld [vmem:[%s4941_s7 + $0x718] sm:$0xff] }
 0x20a   :  { %1685 = vmatpush.msrb.mxu3 %v1019_v31  ;;  %1691 = vmatpush.msrb.mxu0 %v1229_v32  ;;  %v1210_v31 = vld [vmem:[%s4941_s7 + $0x988] sm:$0xff]  ;;  %v915_v32 = vld [vmem:[%s4941_s7 + $0x50] sm:$0xff] }
 0x20b   :  { %1791 = vmatpush.msrb.mxu1 %v1230_v33  ;;  %1686 = vmatmul.f32.vlgmr.msrb.gmra.mxu3 %v3557_v1  ;;  %v1125_v33 = vld [vmem:[%s4941_s7 + $0x6e0] sm:$0xff] }
 0x20c   :  { %1816 = vmatpush.msrb.mxu2 %v1307_v34  ;;  %1750 = vmatpush.msra.mxu3 %v1013_v35  ;;  %v1203_v34 = vld [vmem:[%s4941_s7 + $0x950] sm:$0xff]  ;;  %v1126_v35 = vld [vmem:[%s4941_s7 + $0x6e8] sm:$0xff] }
 0x20d   :  { %1692 = vmatpush.msrb.mxu0 %v1222_v36  ;;  %1792 = vmatpush.msrb.mxu1 %v1223_v37  ;;  %v908_v36 = vld [vmem:[%s4941_s7 + $0x18] sm:$0xff]  ;;  %v1118_v37 = vld [vmem:[%s4941_s7 + $0x6a8] sm:$0xff] }
 0x20e   :  { %1817 = vmatpush.msrb.mxu2 %v1300_v38  ;;  %1751 = vmatpush.msra.mxu3 %v1006_v39  ;;  %v1119_v38 = vld [vmem:[%s4941_s7 + $0x6b0] sm:$0xff]  ;;  %v1426_v39 = vld [vmem:[%s4941_s7 + $0x1048] sm:$0xff] }
 0x20f   :  { %1693 = vmatpush.msrb.mxu0 %v1215_v41  ;;  %1793 = vmatpush.msrb.mxu1 %v1216_v42  ;;  %v1196_v41 = vld [vmem:[%s4941_s7 + $0x918] sm:$0xff]  ;;  %v1111_v42 = vld [vmem:[%s4941_s7 + $0x670] sm:$0xff] }
 0x210   :  { %1818 = vmatpush.msrb.mxu2 %v1293_v44  ;;  %1752 = vmatpush.msra.mxu3 %v999_v45  ;;  %v1112_v44 = vld [vmem:[%s4941_s7 + $0x678] sm:$0xff]  ;;  %v1419_v45 = vld [vmem:[%s4941_s7 + $0x1010] sm:$0xff] }
 0x211   :  { %1626 = vmatmul.f32.vlgmr.msra.gmra.mxu0 %v3838_v53  ;;  %1726 = vmatmul.f32.vlgmr.msra.gmra.mxu1 %v3838_v53 }
 0x212   :  { %1694 = vmatpush.msrb.mxu0 %v1208_v46  ;;  %1794 = vmatpush.msrb.mxu1 %v1209_v49  ;;  %v1189_v46 = vld [vmem:[%s4941_s7 + $0x8e0] sm:$0xff]  ;;  %v1104_v49 = vld [vmem:[%s4941_s7 + $0x638] sm:$0xff] }
 0x213   :  { %1753 = vmatpush.msra.mxu3 %v992_v50  ;;  %1819 = vmatpush.msrb.mxu2 %v1286_v51  ;;  %v1105_v50 = vld [vmem:[%s4941_s7 + $0x640] sm:$0xff]  ;;  %v1412_v51 = vld [vmem:[%s4941_s7 + $0xfd8] sm:$0xff] }
 0x214   :  { %1695 = vmatpush.msrb.mxu0 %v1201_v52  ;;  %1795 = vmatpush.msrb.mxu1 %v1202_v55  ;;  %v1182_v52 = vld [vmem:[%s4941_s7 + $0x8a8] sm:$0xff]  ;;  %v1097_v55 = vld [vmem:[%s4941_s7 + $0x600] sm:$0xff] }
 0x215   :  { %1754 = vmatpush.msra.mxu3 %v985_v57  ;;  %1820 = vmatpush.msrb.mxu2 %v1279_v58  ;;  %v1098_v57 = vld [vmem:[%s4941_s7 + $0x608] sm:$0xff]  ;;  %v1405_v58 = vld [vmem:[%s4941_s7 + $0xfa0] sm:$0xff] }
 0x216   :  { %1696 = vmatpush.msrb.mxu0 %v1194_v59  ;;  %1796 = vmatpush.msrb.mxu1 %v1195_v40  ;;  %v1175_v59 = vld [vmem:[%s4941_s7 + $0x870] sm:$0xff]  ;;  %v1090_v40 = vld [vmem:[%s4941_s7 + $0x5c8] sm:$0xff] }
 0x217   :  { %1755 = vmatpush.msra.mxu3 %v978_v60  ;;  %1821 = vmatpush.msrb.mxu2 %v1272_v56  ;;  %v1091_v60 = vld [vmem:[%s4941_s7 + $0x5d0] sm:$0xff]  ;;  %v1398_v56 = vld [vmem:[%s4941_s7 + $0xf68] sm:$0xff] }
 0x218   :  { %1697 = vmatpush.msrb.mxu0 %v1187_v61  ;;  %1797 = vmatpush.msrb.mxu1 %v1188_v62  ;;  %v1168_v61 = vld [vmem:[%s4941_s7 + $0x838] sm:$0xff]  ;;  %v1083_v62 = vld [vmem:[%s4941_s7 + $0x590] sm:$0xff] }
 0x219   :  { %1756 = vmatpush.msra.mxu3 %v971_v63  ;;  %1822 = vmatpush.msrb.mxu2 %v1265_v0  ;;  %v1084_v63 = vld [vmem:[%s4941_s7 + $0x598] sm:$0xff]  ;;  %v1391_v0 = vld [vmem:[%s4941_s7 + $0xf30] sm:$0xff] }
 0x21a   :  { %1698 = vmatpush.msrb.mxu0 %v1180_v2  ;;  %1798 = vmatpush.msrb.mxu1 %v1181_v3  ;;  %v1161_v2 = vld [vmem:[%s4941_s7 + $0x800] sm:$0xff]  ;;  %v1076_v3 = vld [vmem:[%s4941_s7 + $0x558] sm:$0xff] }
 0x21b   :  { %1757 = vmatpush.msra.mxu3 %v964_v4  ;;  %1823 = vmatpush.msrb.mxu2 %v1258_v54  ;;  %v1077_v4 = vld [vmem:[%s4941_s7 + $0x560] sm:$0xff]  ;;  %v1384_v54 = vld [vmem:[%s4941_s7 + $0xef8] sm:$0xff] }
 0x21c   :  { %1699 = vmatpush.msrb.mxu0 %v1173_v5  ;;  %1799 = vmatpush.msrb.mxu1 %v1174_v6  ;;  %v1154_v5 = vld [vmem:[%s4941_s7 + $0x7c8] sm:$0xff]  ;;  %v1069_v6 = vld [vmem:[%s4941_s7 + $0x520] sm:$0xff] }
 0x21d   :  { %1758 = vmatpush.msra.mxu3 %v957_v7  ;;  %1824 = vmatpush.msrb.mxu2 %v1251_v8  ;;  %v1070_v7 = vld [vmem:[%s4941_s7 + $0x528] sm:$0xff]  ;;  %v1377_v8 = vld [vmem:[%s4941_s7 + $0xec0] sm:$0xff] }
 0x21e   :  { %1700 = vmatpush.msrb.mxu0 %v1166_v9  ;;  %1800 = vmatpush.msrb.mxu1 %v1167_v10  ;;  %v1147_v9 = vld [vmem:[%s4941_s7 + $0x790] sm:$0xff]  ;;  %v1062_v10 = vld [vmem:[%s4941_s7 + $0x4e8] sm:$0xff] }
 0x21f   :  { %1759 = vmatpush.msra.mxu3 %v950_v11  ;;  %1825 = vmatpush.msrb.mxu2 %v1244_v17  ;;  %v1063_v11 = vld [vmem:[%s4941_s7 + $0x4f0] sm:$0xff]  ;;  %v1370_v17 = vld [vmem:[%s4941_s7 + $0xe88] sm:$0xff] }
 0x220   :  { %1701 = vmatpush.msrb.mxu0 %v1159_v12  ;;  %1801 = vmatpush.msrb.mxu1 %v1160_v13  ;;  %v1140_v12 = vld [vmem:[%s4941_s7 + $0x758] sm:$0xff]  ;;  %v1055_v13 = vld [vmem:[%s4941_s7 + $0x4b0] sm:$0xff] }
 0x221   :  { %1826 = vmatmul.f32.vlgmr.msrb.gmra.mxu2 %v3838_v53  ;;  %1760 = vmatpush.msra.mxu3 %v943_v15  ;;  %v1363_v15 = vld [vmem:[%s4941_s7 + $0xe50] sm:$0xff] }
 0x222   :  { %1890 = vmatpush.msra.mxu2 %v1238_v14  ;;  %1702 = vmatpush.msrb.mxu0 %v1152_v16  ;;  %v1056_v14 = vld [vmem:[%s4941_s7 + $0x4b8] sm:$0xff]  ;;  %v1133_v16 = vld [vmem:[%s4941_s7 + $0x720] sm:$0xff] }
 0x223   :  { %1802 = vmatpush.msrb.mxu1 %v1153_v43  ;;  %1761 = vmatpush.msra.mxu3 %v936_v19  ;;  %v1048_v43 = vld [vmem:[%s4941_s7 + $0x478] sm:$0xff]  ;;  %v1127_v19 = vld [vmem:[%s4941_s7 + $0x6f0] sm:$0xff] }
 0x224   :  { %1891 = vmatpush.msra.mxu2 %v1231_v18  ;;  %1703 = vmatpush.msrb.mxu0 %v1145_v20  ;;  %v1049_v18 = vld [vmem:[%s4941_s7 + $0x480] sm:$0xff]  ;;  %v1356_v20 = vld [vmem:[%s4941_s7 + $0xe18] sm:$0xff] }
 0x225   :  { %1803 = vmatpush.msrb.mxu1 %v1146_v21  ;;  %1762 = vmatpush.msra.mxu3 %v929_v23  ;;  %v1041_v21 = vld [vmem:[%s4941_s7 + $0x440] sm:$0xff]  ;;  %v1350_v23 = vld [vmem:[%s4941_s7 + $0xde8] sm:$0xff] }
 0x226   :  { %1892 = vmatpush.msra.mxu2 %v1224_v22  ;;  %1704 = vmatpush.msrb.mxu0 %v1138_v24  ;;  %v1042_v22 = vld [vmem:[%s4941_s7 + $0x448] sm:$0xff]  ;;  %v1120_v24 = vld [vmem:[%s4941_s7 + $0x6b8] sm:$0xff] }
 0x227   :  { %1804 = vmatpush.msrb.mxu1 %v1139_v25  ;;  %1763 = vmatpush.msra.mxu3 %v922_v28  ;;  %v1034_v25 = vld [vmem:[%s4941_s7 + $0x408] sm:$0xff]  ;;  %v1343_v28 = vld [vmem:[%s4941_s7 + $0xdb0] sm:$0xff] }
 0x228   :  { %1893 = vmatpush.msra.mxu2 %v1217_v27  ;;  %1705 = vmatpush.msrb.mxu0 %v1131_v29  ;;  %v1035_v27 = vld [vmem:[%s4941_s7 + $0x410] sm:$0xff]  ;;  %v1113_v29 = vld [vmem:[%s4941_s7 + $0x680] sm:$0xff] }
 0x229   :  { %1805 = vmatpush.msrb.mxu1 %v1132_v30  ;;  %1706 = vmatmul.f32.vlgmr.msrb.gmra.mxu0 %v3667_v48  ;;  %v1027_v30 = vld [vmem:[%s4941_s7 + $0x3d0] sm:$0xff] }
 0x22a   :  { %1894 = vmatpush.msra.mxu2 %v1210_v31  ;;  %1764 = vmatpush.msra.mxu3 %v915_v32  ;;  %v1028_v31 = vld [vmem:[%s4941_s7 + $0x3d8] sm:$0xff] }
 0x22b   :  { %1770 = vmatpush.msra.mxu0 %v1125_v33  ;;  %1806 = vmatmul.f32.vlgmr.msrb.gmra.mxu1 %v3667_v48  ;;  %v1336_v32 = vld [vmem:[%s4941_s7 + $0xd78] sm:$0xff]  ;;  %v1106_v33 = vld [vmem:[%s4941_s7 + $0x648] sm:$0xff] }
 0x22c   :  { %1895 = vmatpush.msra.mxu2 %v1203_v34  ;;  %1870 = vmatpush.msra.mxu1 %v1126_v35  ;;  %v1020_v34 = vld [vmem:[%s4941_s7 + $0x398] sm:$0xff]  ;;  %v1021_v35 = vld [vmem:[%s4941_s7 + $0x3a0] sm:$0xff] }
 0x22d   :  { %1765 = vmatpush.msra.mxu3 %v908_v36  ;;  %1771 = vmatpush.msra.mxu0 %v1118_v37  ;;  %v1329_v36 = vld [vmem:[%s4941_s7 + $0xd40] sm:$0xff]  ;;  %v1099_v37 = vld [vmem:[%s4941_s7 + $0x610] sm:$0xff] }
 0x22e   :  { %1766 = vmatmul.f32.vlgmr.msra.gmra.mxu3 %v3521_v47  ;;  %1871 = vmatpush.msra.mxu1 %v1119_v38  ;;  %v1014_v38 = vld [vmem:[%s4941_s7 + $0x368] sm:$0xff] }
 0x22f   :  { %1835 = vmatpush.msrb.mxu3 %v1426_v39  ;;  %1896 = vmatpush.msra.mxu2 %v1196_v41  ;;  %v1015_v39 = vld [vmem:[%s4941_s7 + $0x370] sm:$0xff]  ;;  %v1322_v41 = vld [vmem:[%s4941_s7 + $0xd08] sm:$0xff] }
 0x230   :  { %1772 = vmatpush.msra.mxu0 %v1111_v42  ;;  %1872 = vmatpush.msra.mxu1 %v1112_v44  ;;  %v1092_v42 = vld [vmem:[%s4941_s7 + $0x5d8] sm:$0xff]  ;;  %v1007_v44 = vld [vmem:[%s4941_s7 + $0x330] sm:$0xff] }
 0x231   :  { %1836 = vmatpush.msrb.mxu3 %v1419_v45  ;;  %1897 = vmatpush.msra.mxu2 %v1189_v46  ;;  %v1008_v45 = vld [vmem:[%s4941_s7 + $0x338] sm:$0xff]  ;;  %v1315_v46 = vld [vmem:[%s4941_s7 + $0xcd0] sm:$0xff] }
 0x232   :  { %1773 = vmatpush.msra.mxu0 %v1104_v49  ;;  %1873 = vmatpush.msra.mxu1 %v1105_v50  ;;  %v1085_v49 = vld [vmem:[%s4941_s7 + $0x5a0] sm:$0xff]  ;;  %v1000_v50 = vld [vmem:[%s4941_s7 + $0x2f8] sm:$0xff] }
 0x233   :  { %1837 = vmatpush.msrb.mxu3 %v1412_v51  ;;  %1898 = vmatpush.msra.mxu2 %v1182_v52  ;;  %v1001_v51 = vld [vmem:[%s4941_s7 + $0x300] sm:$0xff]  ;;  %v1308_v52 = vld [vmem:[%s4941_s7 + $0xc98] sm:$0xff] }
 0x234   :  { %1774 = vmatpush.msra.mxu0 %v1097_v55  ;;  %1874 = vmatpush.msra.mxu1 %v1098_v57  ;;  %v1078_v55 = vld [vmem:[%s4941_s7 + $0x568] sm:$0xff]  ;;  %v993_v57 = vld [vmem:[%s4941_s7 + $0x2c0] sm:$0xff] }
 0x235   :  { %1838 = vmatpush.msrb.mxu3 %v1405_v58  ;;  %1899 = vmatpush.msra.mxu2 %v1175_v59  ;;  %v994_v58 = vld [vmem:[%s4941_s7 + $0x2c8] sm:$0xff]  ;;  %v1301_v59 = vld [vmem:[%s4941_s7 + $0xc60] sm:$0xff] }
 0x236   :  { %1775 = vmatpush.msra.mxu0 %v1090_v40  ;;  %1875 = vmatpush.msra.mxu1 %v1091_v60  ;;  %v1071_v40 = vld [vmem:[%s4941_s7 + $0x530] sm:$0xff]  ;;  %v986_v60 = vld [vmem:[%s4941_s7 + $0x288] sm:$0xff] }
 0x237   :  { %1839 = vmatpush.msrb.mxu3 %v1398_v56  ;;  %1900 = vmatpush.msra.mxu2 %v1168_v61  ;;  %v987_v56 = vld [vmem:[%s4941_s7 + $0x290] sm:$0xff]  ;;  %v1294_v61 = vld [vmem:[%s4941_s7 + $0xc28] sm:$0xff] }
 0x238   :  { %1776 = vmatpush.msra.mxu0 %v1083_v62  ;;  %1876 = vmatpush.msra.mxu1 %v1084_v63  ;;  %v1064_v62 = vld [vmem:[%s4941_s7 + $0x4f8] sm:$0xff]  ;;  %v979_v63 = vld [vmem:[%s4941_s7 + $0x250] sm:$0xff] }
 0x239   :  { %1840 = vmatpush.msrb.mxu3 %v1391_v0  ;;  %1901 = vmatpush.msra.mxu2 %v1161_v2  ;;  %v980_v0 = vld [vmem:[%s4941_s7 + $0x258] sm:$0xff]  ;;  %v1287_v2 = vld [vmem:[%s4941_s7 + $0xbf0] sm:$0xff] }
 0x23a   :  { %1777 = vmatpush.msra.mxu0 %v1076_v3  ;;  %1877 = vmatpush.msra.mxu1 %v1077_v4  ;;  %v1057_v3 = vld [vmem:[%s4941_s7 + $0x4c0] sm:$0xff]  ;;  %v972_v4 = vld [vmem:[%s4941_s7 + $0x218] sm:$0xff] }
 0x23b   :  { %1841 = vmatpush.msrb.mxu3 %v1384_v54  ;;  %1902 = vmatpush.msra.mxu2 %v1154_v5  ;;  %v973_v54 = vld [vmem:[%s4941_s7 + $0x220] sm:$0xff]  ;;  %v1280_v5 = vld [vmem:[%s4941_s7 + $0xbb8] sm:$0xff] }
 0x23c   :  { %1778 = vmatpush.msra.mxu0 %v1069_v6  ;;  %1878 = vmatpush.msra.mxu1 %v1070_v7  ;;  %v1050_v6 = vld [vmem:[%s4941_s7 + $0x488] sm:$0xff]  ;;  %v965_v7 = vld [vmem:[%s4941_s7 + $0x1e0] sm:$0xff] }
 0x23d   :  { %1842 = vmatpush.msrb.mxu3 %v1377_v8  ;;  %1903 = vmatpush.msra.mxu2 %v1147_v9  ;;  %v966_v8 = vld [vmem:[%s4941_s7 + $0x1e8] sm:$0xff]  ;;  %v1273_v9 = vld [vmem:[%s4941_s7 + $0xb80] sm:$0xff] }
 0x23e   :  { %1779 = vmatpush.msra.mxu0 %v1062_v10  ;;  %1879 = vmatpush.msra.mxu1 %v1063_v11  ;;  %v1043_v10 = vld [vmem:[%s4941_s7 + $0x450] sm:$0xff]  ;;  %v958_v11 = vld [vmem:[%s4941_s7 + $0x1a8] sm:$0xff] }
 0x23f   :  { %1843 = vmatpush.msrb.mxu3 %v1370_v17  ;;  %1904 = vmatpush.msra.mxu2 %v1140_v12  ;;  %v959_v17 = vld [vmem:[%s4941_s7 + $0x1b0] sm:$0xff]  ;;  %v1266_v12 = vld [vmem:[%s4941_s7 + $0xb48] sm:$0xff] }
 0x240   :  { %1780 = vmatpush.msra.mxu0 %v1055_v13  ;;  %1880 = vmatpush.msra.mxu1 %v1056_v14  ;;  %v1036_v13 = vld [vmem:[%s4941_s7 + $0x418] sm:$0xff]  ;;  %v951_v14 = vld [vmem:[%s4941_s7 + $0x170] sm:$0xff] }
 0x241   :  { %1844 = vmatpush.msrb.mxu3 %v1363_v15  ;;  %1905 = vmatpush.msra.mxu2 %v1133_v16  ;;  %v952_v15 = vld [vmem:[%s4941_s7 + $0x178] sm:$0xff]  ;;  %v1259_v16 = vld [vmem:[%s4941_s7 + $0xb10] sm:$0xff] }
 0x242   :  { %1781 = vmatpush.msra.mxu0 %v1048_v43  ;;  %1881 = vmatpush.msra.mxu1 %v1049_v18  ;;  %v1029_v43 = vld [vmem:[%s4941_s7 + $0x3e0] sm:$0xff]  ;;  %v944_v18 = vld [vmem:[%s4941_s7 + $0x138] sm:$0xff] }
 0x243   :  { %1906 = vmatmul.f32.vlgmr.msra.gmra.mxu2 %v3667_v48  ;;  %1845 = vmatpush.msrb.mxu3 %v1356_v20  ;;  %v1252_v20 = vld [vmem:[%s4941_s7 + $0xad8] sm:$0xff] }
 0x244   :  { %1970 = vmatpush.msrb.mxu2 %v1127_v19  ;;  %1782 = vmatpush.msra.mxu0 %v1041_v21  ;;  %v945_v19 = vld [vmem:[%s4941_s7 + $0x140] sm:$0xff]  ;;  %v1022_v21 = vld [vmem:[%s4941_s7 + $0x3a8] sm:$0xff] }
 0x245   :  { %2218 = vmatmul.msk.f32.vlgmr.msrb.gmra.mxu3 %vm1446_vm5, %v3927_v26  ;;  %1882 = vmatpush.msra.mxu1 %v1042_v22  ;;  %v937_v22 = vld [vmem:[%s4941_s7 + $0x100] sm:$0xff] }
 0x246   :  { %1910 = vmatpush.msra.mxu3 %v1350_v23  ;;  %1971 = vmatpush.msrb.mxu2 %v1120_v24  ;;  %v938_v23 = vld [vmem:[%s4941_s7 + $0x108] sm:$0xff]  ;;  %v1016_v24 = vld [vmem:[%s4941_s7 + $0x378] sm:$0xff] }
 0x247   :  { %1783 = vmatpush.msra.mxu0 %v1034_v25  ;;  %1883 = vmatpush.msra.mxu1 %v1035_v27  ;;  %v1245_v25 = vld [vmem:[%s4941_s7 + $0xaa0] sm:$0xff]  ;;  %v930_v27 = vld [vmem:[%s4941_s7 + $0xc8] sm:$0xff] }
 0x248   :  { %1911 = vmatpush.msra.mxu3 %v1343_v28  ;;  %1972 = vmatpush.msrb.mxu2 %v1113_v29  ;;  %v931_v28 = vld [vmem:[%s4941_s7 + $0xd0] sm:$0xff] }
 0x249   :  { %1784 = vmatpush.msra.mxu0 %v1027_v30  ;;  %1884 = vmatpush.msra.mxu1 %v1028_v31  ;;  %v1239_v29 = vld [vmem:[%s4941_s7 + $0xa70] sm:$0xff]  ;;  %v1009_v30 = vld [vmem:[%s4941_s7 + $0x340] sm:$0xff] }
 0x24a   :  { %1912 = vmatpush.msra.mxu3 %v1336_v32  ;;  %1973 = vmatpush.msrb.mxu2 %v1106_v33  ;;  %v923_v31 = vld [vmem:[%s4941_s7 + $0x90] sm:$0xff]  ;;  %v924_v32 = vld [vmem:[%s4941_s7 + $0x98] sm:$0xff] }
 0x24b   :  { %1785 = vmatpush.msra.mxu0 %v1020_v34  ;;  %1885 = vmatpush.msra.mxu1 %v1021_v35  ;;  %v1232_v33 = vld [vmem:[%s4941_s7 + $0xa38] sm:$0xff]  ;;  %v1002_v34 = vld [vmem:[%s4941_s7 + $0x308] sm:$0xff] }
 0x24c   :  { %1913 = vmatpush.msra.mxu3 %v1329_v36  ;;  %1974 = vmatpush.msrb.mxu2 %v1099_v37  ;;  %v916_v35 = vld [vmem:[%s4941_s7 + $0x58] sm:$0xff]  ;;  %v917_v36 = vld [vmem:[%s4941_s7 + $0x60] sm:$0xff] }
 0x24d   :  { %1786 = vmatmul.f32.vlgmr.msra.gmra.mxu0 %v3557_v1  ;;  %1886 = vmatmul.f32.vlgmr.msra.gmra.mxu1 %v3557_v1  ;;  %v1225_v37 = vld [vmem:[%s4941_s7 + $0xa00] sm:$0xff] }
 0x24e   :  { %1850 = vmatpush.msrb.mxu0 %v1014_v38  ;;  %1950 = vmatpush.msrb.mxu1 %v1015_v39  ;;  %v995_v38 = vld [vmem:[%s4941_s7 + $0x2d0] sm:$0xff]  ;;  %v909_v39 = vld [vmem:[%s4941_s7 + $0x20] sm:$0xff] }
 0x24f   :  { %1914 = vmatpush.msra.mxu3 %v1322_v41  ;;  %1975 = vmatpush.msrb.mxu2 %v1092_v42  ;;  %v910_v41 = vld [vmem:[%s4941_s7 + $0x28] sm:$0xff] }
 0x250   :  { %1851 = vmatpush.msrb.mxu0 %v1007_v44  ;;  %1951 = vmatpush.msrb.mxu1 %v1008_v45  ;;  %v1218_v42 = vld [vmem:[%s4941_s7 + $0x9c8] sm:$0xff]  ;;  %v988_v44 = vld [vmem:[%s4941_s7 + $0x298] sm:$0xff]  ;;  %v1427_v45 = vld [vmem:[%s4941_s7 + $0x1050] sm:$0xff] }
 0x251   :  { %1915 = vmatpush.msra.mxu3 %v1315_v46  ;;  %1976 = vmatpush.msrb.mxu2 %v1085_v49  ;;  %v1428_v46 = vld [vmem:[%s4941_s7 + $0x1058] sm:$0xff]  ;;  %v1211_v49 = vld [vmem:[%s4941_s7 + $0x990] sm:$0xff] }
 0x252   :  { %1852 = vmatpush.msrb.mxu0 %v1000_v50  ;;  %1952 = vmatpush.msrb.mxu1 %v1001_v51  ;;  %v981_v50 = vld [vmem:[%s4941_s7 + $0x260] sm:$0xff]  ;;  %v1420_v51 = vld [vmem:[%s4941_s7 + $0x1018] sm:$0xff] }
 0x253   :  { %1916 = vmatpush.msra.mxu3 %v1308_v52  ;;  %1977 = vmatpush.msrb.mxu2 %v1078_v55  ;;  %v1421_v52 = vld [vmem:[%s4941_s7 + $0x1020] sm:$0xff]  ;;  %v1204_v55 = vld [vmem:[%s4941_s7 + $0x958] sm:$0xff] }
 0x254   :  { %1853 = vmatpush.msrb.mxu0 %v993_v57  ;;  %1953 = vmatpush.msrb.mxu1 %v994_v58  ;;  %v974_v57 = vld [vmem:[%s4941_s7 + $0x228] sm:$0xff]  ;;  %v1413_v58 = vld [vmem:[%s4941_s7 + $0xfe0] sm:$0xff] }
 0x255   :  { %1917 = vmatpush.msra.mxu3 %v1301_v59  ;;  %1978 = vmatpush.msrb.mxu2 %v1071_v40  ;;  %v1414_v59 = vld [vmem:[%s4941_s7 + $0xfe8] sm:$0xff]  ;;  %v1197_v40 = vld [vmem:[%s4941_s7 + $0x920] sm:$0xff] }
 0x256   :  { %1854 = vmatpush.msrb.mxu0 %v986_v60  ;;  %1954 = vmatpush.msrb.mxu1 %v987_v56  ;;  %v967_v60 = vld [vmem:[%s4941_s7 + $0x1f0] sm:$0xff]  ;;  %v1406_v56 = vld [vmem:[%s4941_s7 + $0xfa8] sm:$0xff] }
 0x257   :  { %1918 = vmatpush.msra.mxu3 %v1294_v61  ;;  %1979 = vmatpush.msrb.mxu2 %v1064_v62  ;;  %v1407_v61 = vld [vmem:[%s4941_s7 + $0xfb0] sm:$0xff]  ;;  %v1190_v62 = vld [vmem:[%s4941_s7 + $0x8e8] sm:$0xff] }
 0x258   :  { %1855 = vmatpush.msrb.mxu0 %v979_v63  ;;  %1955 = vmatpush.msrb.mxu1 %v980_v0  ;;  %v960_v63 = vld [vmem:[%s4941_s7 + $0x1b8] sm:$0xff]  ;;  %v1399_v0 = vld [vmem:[%s4941_s7 + $0xf70] sm:$0xff] }
 0x259   :  { %1919 = vmatpush.msra.mxu3 %v1287_v2  ;;  %1980 = vmatpush.msrb.mxu2 %v1057_v3  ;;  %v1400_v2 = vld [vmem:[%s4941_s7 + $0xf78] sm:$0xff]  ;;  %v1183_v3 = vld [vmem:[%s4941_s7 + $0x8b0] sm:$0xff] }
 0x25a   :  { %1856 = vmatpush.msrb.mxu0 %v972_v4  ;;  %1956 = vmatpush.msrb.mxu1 %v973_v54  ;;  %v953_v4 = vld [vmem:[%s4941_s7 + $0x180] sm:$0xff]  ;;  %v1392_v54 = vld [vmem:[%s4941_s7 + $0xf38] sm:$0xff] }
 0x25b   :  { %1920 = vmatpush.msra.mxu3 %v1280_v5  ;;  %1981 = vmatpush.msrb.mxu2 %v1050_v6  ;;  %v1393_v5 = vld [vmem:[%s4941_s7 + $0xf40] sm:$0xff]  ;;  %v1176_v6 = vld [vmem:[%s4941_s7 + $0x878] sm:$0xff] }
 0x25c   :  { %1857 = vmatpush.msrb.mxu0 %v965_v7  ;;  %1957 = vmatpush.msrb.mxu1 %v966_v8  ;;  %v946_v7 = vld [vmem:[%s4941_s7 + $0x148] sm:$0xff]  ;;  %v1385_v8 = vld [vmem:[%s4941_s7 + $0xf00] sm:$0xff] }
 0x25d   :  { %1921 = vmatpush.msra.mxu3 %v1273_v9  ;;  %1982 = vmatpush.msrb.mxu2 %v1043_v10  ;;  %v1386_v9 = vld [vmem:[%s4941_s7 + $0xf08] sm:$0xff]  ;;  %v1169_v10 = vld [vmem:[%s4941_s7 + $0x840] sm:$0xff] }
 0x25e   :  { %1858 = vmatpush.msrb.mxu0 %v958_v11  ;;  %1958 = vmatpush.msrb.mxu1 %v959_v17  ;;  %v939_v11 = vld [vmem:[%s4941_s7 + $0x110] sm:$0xff]  ;;  %v1378_v17 = vld [vmem:[%s4941_s7 + $0xec8] sm:$0xff] }
 0x25f   :  { %1922 = vmatpush.msra.mxu3 %v1266_v12  ;;  %1983 = vmatpush.msrb.mxu2 %v1036_v13  ;;  %v1379_v12 = vld [vmem:[%s4941_s7 + $0xed0] sm:$0xff]  ;;  %v1162_v13 = vld [vmem:[%s4941_s7 + $0x808] sm:$0xff] }
 0x260   :  { %1859 = vmatpush.msrb.mxu0 %v951_v14  ;;  %1959 = vmatpush.msrb.mxu1 %v952_v15  ;;  %v932_v14 = vld [vmem:[%s4941_s7 + $0xd8] sm:$0xff]  ;;  %v1371_v15 = vld [vmem:[%s4941_s7 + $0xe90] sm:$0xff] }
 0x261   :  { %1923 = vmatpush.msra.mxu3 %v1259_v16  ;;  %1984 = vmatpush.msrb.mxu2 %v1029_v43  ;;  %v1372_v16 = vld [vmem:[%s4941_s7 + $0xe98] sm:$0xff]  ;;  %v1155_v43 = vld [vmem:[%s4941_s7 + $0x7d0] sm:$0xff] }
 0x262   :  { %1860 = vmatpush.msrb.mxu0 %v944_v18  ;;  %1960 = vmatpush.msrb.mxu1 %v945_v19  ;;  %v925_v18 = vld [vmem:[%s4941_s7 + $0xa0] sm:$0xff]  ;;  %v1364_v19 = vld [vmem:[%s4941_s7 + $0xe58] sm:$0xff] }
 0x263   :  { %1924 = vmatpush.msra.mxu3 %v1252_v20  ;;  %1985 = vmatpush.msrb.mxu2 %v1022_v21  ;;  %v1365_v20 = vld [vmem:[%s4941_s7 + $0xe60] sm:$0xff]  ;;  %v1148_v21 = vld [vmem:[%s4941_s7 + $0x798] sm:$0xff] }
 0x264   :  { %1861 = vmatpush.msrb.mxu0 %v937_v22  ;;  %1961 = vmatpush.msrb.mxu1 %v938_v23  ;;  %v918_v22 = vld [vmem:[%s4941_s7 + $0x68] sm:$0xff]  ;;  %v1357_v23 = vld [vmem:[%s4941_s7 + $0xe20] sm:$0xff] }
 0x265   :  { %1986 = vmatmul.f32.vlgmr.msrb.gmra.mxu2 %v3557_v1  ;;  %1925 = vmatpush.msra.mxu3 %v1245_v25  ;;  %v1141_v25 = vld [vmem:[%s4941_s7 + $0x760] sm:$0xff] }
 0x266   :  { %2050 = vmatpush.msra.mxu2 %v1016_v24  ;;  %1862 = vmatpush.msrb.mxu0 %v930_v27  ;;  %v1358_v24 = vld [vmem:[%s4941_s7 + $0xe28] sm:$0xff]  ;;  %v1351_v27 = vld [vmem:[%s4941_s7 + $0xdf0] sm:$0xff] }
 0x267   :  { %1926 = vmatmul.f32.vlgmr.msra.gmra.mxu3 %v3838_v53  ;;  %1962 = vmatpush.msrb.mxu1 %v931_v28  ;;  %v911_v28 = vld [vmem:[%s4941_s7 + $0x30] sm:$0xff] }
 0x268   :  { %1990 = vmatpush.msrb.mxu3 %v1239_v29  ;;  %2051 = vmatpush.msra.mxu2 %v1009_v30  ;;  %v1352_v29 = vld [vmem:[%s4941_s7 + $0xdf8] sm:$0xff]  ;;  %v1429_v30 = vld [vmem:[%s4941_s7 + $0x1060] sm:$0xff] }
 0x269   :  { %1863 = vmatpush.msrb.mxu0 %v923_v31  ;;  %1963 = vmatpush.msrb.mxu1 %v924_v32  ;;  %v1134_v31 = vld [vmem:[%s4941_s7 + $0x728] sm:$0xff]  ;;  %v1344_v32 = vld [vmem:[%s4941_s7 + $0xdb8] sm:$0xff] }
 0x26a   :  { %1991 = vmatpush.msrb.mxu3 %v1232_v33  ;;  %2052 = vmatpush.msra.mxu2 %v1002_v34  ;;  %v1345_v33 = vld [vmem:[%s4941_s7 + $0xdc0] sm:$0xff]  ;;  %v1422_v34 = vld [vmem:[%s4941_s7 + $0x1028] sm:$0xff] }
 0x26b   :  { %1864 = vmatpush.msrb.mxu0 %v916_v35  ;;  %1964 = vmatpush.msrb.mxu1 %v917_v36  ;;  %v1128_v35 = vld [vmem:[%s4941_s7 + $0x6f8] sm:$0xff]  ;;  %v1337_v36 = vld [vmem:[%s4941_s7 + $0xd80] sm:$0xff] }
 0x26c   :  { %1992 = vmatpush.msrb.mxu3 %v1225_v37  ;;  %2053 = vmatpush.msra.mxu2 %v995_v38  ;;  %v1415_v37 = vld [vmem:[%s4941_s7 + $0xff0] sm:$0xff]  ;;  %v1121_v38 = vld [vmem:[%s4941_s7 + $0x6c0] sm:$0xff] }
 0x26d   :  { %1865 = vmatpush.msrb.mxu0 %v909_v39  ;;  %1965 = vmatpush.msrb.mxu1 %v910_v41  ;;  %v1330_v39 = vld [vmem:[%s4941_s7 + $0xd48] sm:$0xff]  ;;  %v1331_v41 = vld [vmem:[%s4941_s7 + $0xd50] sm:$0xff] }
 0x26e   :  { %1993 = vmatpush.msrb.mxu3 %v1218_v42  ;;  %2054 = vmatpush.msra.mxu2 %v988_v44  ;;  %v1408_v42 = vld [vmem:[%s4941_s7 + $0xfb8] sm:$0xff]  ;;  %v1114_v44 = vld [vmem:[%s4941_s7 + $0x688] sm:$0xff] }
 0x26f   :  { %1866 = vmatmul.f32.vlgmr.msrb.gmra.mxu0 %v3521_v47  ;;  %1966 = vmatmul.f32.vlgmr.msrb.gmra.mxu1 %v3521_v47 }
 0x270   :  { %1935 = vmatpush.msra.mxu0 %v1427_v45  ;;  %2035 = vmatpush.msra.mxu1 %v1428_v46  ;;  %v1323_v45 = vld [vmem:[%s4941_s7 + $0xd10] sm:$0xff]  ;;  %v1324_v46 = vld [vmem:[%s4941_s7 + $0xd18] sm:$0xff] }
 0x271   :  { %1994 = vmatpush.msrb.mxu3 %v1211_v49  ;;  %2055 = vmatpush.msra.mxu2 %v981_v50  ;;  %v1401_v49 = vld [vmem:[%s4941_s7 + $0xf80] sm:$0xff]  ;;  %v1107_v50 = vld [vmem:[%s4941_s7 + $0x650] sm:$0xff] }
 0x272   :  { %1936 = vmatpush.msra.mxu0 %v1420_v51  ;;  %2036 = vmatpush.msra.mxu1 %v1421_v52  ;;  %v1316_v51 = vld [vmem:[%s4941_s7 + $0xcd8] sm:$0xff]  ;;  %v1317_v52 = vld [vmem:[%s4941_s7 + $0xce0] sm:$0xff] }
 0x273   :  { %1995 = vmatpush.msrb.mxu3 %v1204_v55  ;;  %2056 = vmatpush.msra.mxu2 %v974_v57  ;;  %v1394_v55 = vld [vmem:[%s4941_s7 + $0xf48] sm:$0xff]  ;;  %v1100_v57 = vld [vmem:[%s4941_s7 + $0x618] sm:$0xff] }
 0x274   :  { %1937 = vmatpush.msra.mxu0 %v1413_v58  ;;  %2037 = vmatpush.msra.mxu1 %v1414_v59  ;;  %v1309_v58 = vld [vmem:[%s4941_s7 + $0xca0] sm:$0xff]  ;;  %v1310_v59 = vld [vmem:[%s4941_s7 + $0xca8] sm:$0xff] }
 0x275   :  { %1996 = vmatpush.msrb.mxu3 %v1197_v40  ;;  %2057 = vmatpush.msra.mxu2 %v967_v60  ;;  %v1387_v40 = vld [vmem:[%s4941_s7 + $0xf10] sm:$0xff]  ;;  %v1093_v60 = vld [vmem:[%s4941_s7 + $0x5e0] sm:$0xff] }
 0x276   :  { %1938 = vmatpush.msra.mxu0 %v1406_v56  ;;  %2038 = vmatpush.msra.mxu1 %v1407_v61  ;;  %v1302_v56 = vld [vmem:[%s4941_s7 + $0xc68] sm:$0xff]  ;;  %v1303_v61 = vld [vmem:[%s4941_s7 + $0xc70] sm:$0xff] }
 0x277   :  { %1997 = vmatpush.msrb.mxu3 %v1190_v62  ;;  %2058 = vmatpush.msra.mxu2 %v960_v63  ;;  %v1380_v62 = vld [vmem:[%s4941_s7 + $0xed8] sm:$0xff]  ;;  %v1086_v63 = vld [vmem:[%s4941_s7 + $0x5a8] sm:$0xff] }
 0x278   :  { %1939 = vmatpush.msra.mxu0 %v1399_v0  ;;  %2039 = vmatpush.msra.mxu1 %v1400_v2  ;;  %v1295_v0 = vld [vmem:[%s4941_s7 + $0xc30] sm:$0xff]  ;;  %v1296_v2 = vld [vmem:[%s4941_s7 + $0xc38] sm:$0xff] }
 0x279   :  { %1998 = vmatpush.msrb.mxu3 %v1183_v3  ;;  %2059 = vmatpush.msra.mxu2 %v953_v4  ;;  %v1373_v3 = vld [vmem:[%s4941_s7 + $0xea0] sm:$0xff]  ;;  %v1079_v4 = vld [vmem:[%s4941_s7 + $0x570] sm:$0xff] }
 0x27a   :  { %1940 = vmatpush.msra.mxu0 %v1392_v54  ;;  %2040 = vmatpush.msra.mxu1 %v1393_v5  ;;  %v1288_v54 = vld [vmem:[%s4941_s7 + $0xbf8] sm:$0xff]  ;;  %v1289_v5 = vld [vmem:[%s4941_s7 + $0xc00] sm:$0xff] }
 0x27b   :  { %1999 = vmatpush.msrb.mxu3 %v1176_v6  ;;  %2060 = vmatpush.msra.mxu2 %v946_v7  ;;  %v1366_v6 = vld [vmem:[%s4941_s7 + $0xe68] sm:$0xff]  ;;  %v1072_v7 = vld [vmem:[%s4941_s7 + $0x538] sm:$0xff] }
 0x27c   :  { %1941 = vmatpush.msra.mxu0 %v1385_v8  ;;  %2041 = vmatpush.msra.mxu1 %v1386_v9  ;;  %v1281_v8 = vld [vmem:[%s4941_s7 + $0xbc0] sm:$0xff]  ;;  %v1282_v9 = vld [vmem:[%s4941_s7 + $0xbc8] sm:$0xff] }
 0x27d   :  { %2000 = vmatpush.msrb.mxu3 %v1169_v10  ;;  %2061 = vmatpush.msra.mxu2 %v939_v11  ;;  %v1359_v10 = vld [vmem:[%s4941_s7 + $0xe30] sm:$0xff]  ;;  %v1065_v11 = vld [vmem:[%s4941_s7 + $0x500] sm:$0xff] }
 0x27e   :  { %1942 = vmatpush.msra.mxu0 %v1378_v17  ;;  %2042 = vmatpush.msra.mxu1 %v1379_v12  ;;  %v1274_v17 = vld [vmem:[%s4941_s7 + $0xb88] sm:$0xff]  ;;  %v1275_v12 = vld [vmem:[%s4941_s7 + $0xb90] sm:$0xff] }
 0x27f   :  { %2001 = vmatpush.msrb.mxu3 %v1162_v13  ;;  %2062 = vmatpush.msra.mxu2 %v932_v14  ;;  %v1058_v13 = vld [vmem:[%s4941_s7 + $0x4c8] sm:$0xff]  ;;  %v1267_v14 = vld [vmem:[%s4941_s7 + $0xb50] sm:$0xff] }
 0x280   :  { %1943 = vmatpush.msra.mxu0 %v1371_v15  ;;  %2043 = vmatpush.msra.mxu1 %v1372_v16  ;;  %v1268_v15 = vld [vmem:[%s4941_s7 + $0xb58] sm:$0xff]  ;;  %v1051_v16 = vld [vmem:[%s4941_s7 + $0x490] sm:$0xff] }
 0x281   :  { %2002 = vmatpush.msrb.mxu3 %v1155_v43  ;;  %2063 = vmatpush.msra.mxu2 %v925_v18  ;;  %v1260_v43 = vld [vmem:[%s4941_s7 + $0xb18] sm:$0xff]  ;;  %v1261_v18 = vld [vmem:[%s4941_s7 + $0xb20] sm:$0xff] }
 0x282   :  { %1944 = vmatpush.msra.mxu0 %v1364_v19  ;;  %2044 = vmatpush.msra.mxu1 %v1365_v20  ;;  %v1044_v19 = vld [vmem:[%s4941_s7 + $0x458] sm:$0xff]  ;;  %v1254_v20 = vld [vmem:[%s4941_s7 + $0xae8] sm:$0xff] }
 0x283   :  { %2003 = vmatpush.msrb.mxu3 %v1148_v21  ;;  %2064 = vmatpush.msra.mxu2 %v918_v22  ;;  %v1037_v21 = vld [vmem:[%s4941_s7 + $0x420] sm:$0xff]  ;;  %v1246_v22 = vld [vmem:[%s4941_s7 + $0xaa8] sm:$0xff] }
 0x284   :  { %1945 = vmatpush.msra.mxu0 %v1357_v23  ;;  %2045 = vmatpush.msra.mxu1 %v1358_v24  ;;  %v1247_v23 = vld [vmem:[%s4941_s7 + $0xab0] sm:$0xff]  ;;  %v1030_v24 = vld [vmem:[%s4941_s7 + $0x3e8] sm:$0xff] }
 0x285   :  { %2219 = vmatmul.msk.f32.vlgmr.msra.gmra.mxu0 %vm1446_vm5, %v3927_v26  ;;  %2004 = vmatpush.msrb.mxu3 %v1141_v25  ;;  %v1240_v25 = vld [vmem:[%s4941_s7 + $0xa78] sm:$0xff] }
 0x286   :  { %2010 = vmatpush.msrb.mxu0 %v1351_v27  ;;  %2220 = vmatmul.msk.f32.vlgmr.msra.gmra.mxu1 %vm1446_vm5, %v3927_v26  ;;  %v1023_v27 = vld [vmem:[%s4941_s7 + $0x3b0] sm:$0xff] }
 0x287   :  { %2065 = vmatpush.msra.mxu2 %v911_v28  ;;  %2110 = vmatpush.msrb.mxu1 %v1352_v29  ;;  %v1233_v28 = vld [vmem:[%s4941_s7 + $0xa40] sm:$0xff]  ;;  %v4857_v29 = vpop.f32.mrf.mxu0 }
 0x288   :  { %2066 = vmatmul.f32.vlgmr.msra.gmra.mxu2 %v3521_v47  ;;  %2005 = vmatpush.msrb.mxu3 %v1134_v31  ;;  %v1338_v47 = vld [vmem:[%s4941_s7 + $0xd88] sm:$0xff] }
 0x289   :  { %2135 = vmatpush.msrb.mxu2 %v1429_v30  ;;  %2011 = vmatpush.msrb.mxu0 %v1344_v32  ;;  %v4859_v30 = vpop.f32.mrf.mxu1  ;;  %v1226_v31 = vld [vmem:[%s4941_s7 + $0xa08] sm:$0xff]  ;;  %v1219_v32 = vld [vmem:[%s4941_s7 + $0x9d0] sm:$0xff] }
 0x28a   :  { %2111 = vmatpush.msrb.mxu1 %v1345_v33  ;;  %2006 = vmatmul.f32.vlgmr.msrb.gmra.mxu3 %v3667_v48  ;;  %v1507_v33 = vpop.f32.mrf.mxu2 }
 0x28b   :  { %2136 = vmatpush.msrb.mxu2 %v1422_v34  ;;  %2070 = vmatpush.msra.mxu3 %v1128_v35  ;;  %v4869_v34 = vpop.f32.mrf.mxu3  ;;  %v1205_v35 = vld [vmem:[%s4941_s7 + $0x960] sm:$0xff] }
 0x28c   :  { %2012 = vmatpush.msrb.mxu0 %v1337_v36  ;;  %2112 = vmatpush.msrb.mxu1 %v1338_v47 }
 0x28d   :  { %2137 = vmatpush.msrb.mxu2 %v1415_v37  ;;  %2071 = vmatpush.msra.mxu3 %v1121_v38  ;;  %v1191_v37 = vld [vmem:[%s4941_s7 + $0x8f0] sm:$0xff]  ;;  %v1184_v38 = vld [vmem:[%s4941_s7 + $0x8b8] sm:$0xff] }
 0x28e   :  { %2013 = vmatpush.msrb.mxu0 %v1330_v39  ;;  %2113 = vmatpush.msrb.mxu1 %v1331_v41 }
 0x28f   :  { %2138 = vmatpush.msrb.mxu2 %v1408_v42  ;;  %2072 = vmatpush.msra.mxu3 %v1114_v44  ;;  %v4877_v36 = vpop.f32.mrf.mxu0  ;;  %v1177_v42 = vld [vmem:[%s4941_s7 + $0x880] sm:$0xff]  ;;  %v1170_v44 = vld [vmem:[%s4941_s7 + $0x848] sm:$0xff] }
 0x290   :  { %2014 = vmatpush.msrb.mxu0 %v1323_v45  ;;  %2114 = vmatpush.msrb.mxu1 %v1324_v46 }
 0x291   :  { %2139 = vmatpush.msrb.mxu2 %v1401_v49  ;;  %2073 = vmatpush.msra.mxu3 %v1107_v50  ;;  %v1567_v47 = vpop.f32.mrf.mxu1  ;;  %v1163_v49 = vld [vmem:[%s4941_s7 + $0x810] sm:$0xff]  ;;  %v4900_v50 = vld [vmem:[%s4942_s8] sm:$0x7f] }
 0x292   :  { %2015 = vmatpush.msrb.mxu0 %v1316_v51  ;;  %2115 = vmatpush.msrb.mxu1 %v1317_v52  ;;  %v1587_v39 = vpop.f32.mrf.mxu2  ;;  %v1433_v51 = vperm.slane %v4900_v50, 1  ;;  %v1434_v52 = vperm.slane %v4900_v50, 2 }
 0x293   :  { %2140 = vmatpush.msrb.mxu2 %v1394_v55  ;;  %2074 = vmatpush.msra.mxu3 %v1100_v57  ;;  %v1607_v41 = vpop.f32.mrf.mxu3  ;;  %v1156_v55 = vld [vmem:[%s4941_s7 + $0x7d8] sm:$0xff] }
 0x294   :  { %2016 = vmatpush.msrb.mxu0 %v1309_v58  ;;  %2116 = vmatpush.msrb.mxu1 %v1310_v59  ;;  %v1149_v59 = vld [vmem:[%s4941_s7 + $0x7a0] sm:$0xff] }
 0x295   :  { %2141 = vmatpush.msrb.mxu2 %v1387_v40  ;;  %2075 = vmatpush.msra.mxu3 %v1093_v60  ;;  %v1568_v40 = vadd.f32 %v1567_v47, %v1433_v51  ;;  %v1438_v51 = vperm.slane %v4900_v50, 6 }
 0x296   :  { %2017 = vmatpush.msrb.mxu0 %v1302_v56  ;;  %2117 = vmatpush.msrb.mxu1 %v1303_v61  ;;  %v1142_v56 = vld [vmem:[%s4941_s7 + $0x768] sm:$0xff] }
 0x297   :  { %2142 = vmatpush.msrb.mxu2 %v1380_v62  ;;  %2076 = vmatpush.msra.mxu3 %v1086_v63  ;;  %v1627_v46 = vpop.f32.mrf.mxu0  ;;  %v1588_v62 = vadd.f32 %v1587_v39, %v1568_v40  ;;  %v1436_v39 = vperm.slane %v4900_v50, 4 }
 0x298   :  { %2018 = vmatpush.msrb.mxu0 %v1295_v0  ;;  %2118 = vmatpush.msrb.mxu1 %v1296_v2  ;;  %v1135_v0 = vld [vmem:[%s4941_s7 + $0x730] sm:$0xff] }
 0x299   :  { %2143 = vmatpush.msrb.mxu2 %v1373_v3  ;;  %2077 = vmatpush.msra.mxu3 %v1079_v4  ;;  %v1647_v45 = vpop.f32.mrf.mxu1  ;;  %v1432_v3 = vperm.slane %v4900_v50, 0  ;;  %v1608_v4 = vadd.f32 %v1607_v41, %v1588_v62 }
 0x29a   :  { %2019 = vmatpush.msrb.mxu0 %v1288_v54  ;;  %2119 = vmatpush.msrb.mxu1 %v1289_v5  ;;  %v1667_v57 = vpop.f32.mrf.mxu2  ;;  %v1435_v5 = vperm.slane %v4900_v50, 3 }
 0x29b   :  { %2144 = vmatpush.msrb.mxu2 %v1366_v6  ;;  %2078 = vmatpush.msra.mxu3 %v1072_v7  ;;  %v1687_v58 = vpop.f32.mrf.mxu3  ;;  %v1668_v60 = vadd.f32 %v1667_v57, %v1434_v52 }
 0x29c   :  { %2020 = vmatpush.msrb.mxu0 %v1281_v8  ;;  %2120 = vmatpush.msrb.mxu1 %v1282_v9  ;;  %v1628_v8 = vadd.f32 %v1627_v46, %v1608_v4  ;;  %v1468_v9 = vadd.f32 %v4857_v29, %v1432_v3 }
 0x29d   :  { %2145 = vmatpush.msrb.mxu2 %v1359_v10  ;;  %2079 = vmatpush.msra.mxu3 %v1065_v11  ;;  %v1688_v63 = vadd.f32 %v1687_v58, %v1668_v60 }
 0x29e   :  { %2021 = vmatpush.msrb.mxu0 %v1274_v17  ;;  %2121 = vmatpush.msrb.mxu1 %v1275_v12  ;;  %v1488_v12 = vadd.f32 %v4859_v30, %v1468_v9 }
 0x29f   :  { %2221 = vmatmul.msk.f32.vlgmr.msrb.gmra.mxu2 %vm1446_vm5, %v3927_v26  ;;  %2080 = vmatpush.msra.mxu3 %v1058_v13  ;;  %v1253_v26 = vld [vmem:[%s4941_s7 + $0xae0] sm:$0xff]  ;;  %v1648_v13 = vadd.f32 %v1647_v45, %v1628_v8 }
 0x2a0   :  { %2022 = vmatpush.msrb.mxu0 %v1267_v14  ;;  %2122 = vmatpush.msrb.mxu1 %v1268_v15 }
 0x2a1   :  { %2081 = vmatpush.msra.mxu3 %v1051_v16  ;;  %v1727_v2 = vpop.f32.mrf.mxu1  ;;  %v1508_v16 = vadd.f32 %v1507_v33, %v1488_v12 }
 0x2a2   :  { %2023 = vmatpush.msrb.mxu0 %v1260_v43  ;;  %2123 = vmatpush.msrb.mxu1 %v1261_v18  ;;  %v1747_v6 = vpop.f32.mrf.mxu2 }
 0x2a3   :  { %2082 = vmatpush.msra.mxu3 %v1044_v19 }
 0x2a4   :  { %2024 = vmatpush.msrb.mxu0 %v1253_v26  ;;  %2124 = vmatpush.msrb.mxu1 %v1254_v20  ;;  %v1528_v26 = vadd.f32 %v4869_v34, %v1508_v16  ;;  %v2151_v20 = vmax.f32 %v1648_v13, 0.0 }
 0x2a5   :  { %2083 = vmatpush.msra.mxu3 %v1037_v21 }
 0x2a6   :  { %2025 = vmatpush.msrb.mxu0 %v1246_v22  ;;  %2125 = vmatpush.msrb.mxu1 %v1247_v23  ;;  %v1707_v61 = vpop.f32.mrf.mxu0 }
 0x2a7   :  { %2026 = vmatmul.f32.vlgmr.msrb.gmra.mxu0 %v3838_v53  ;;  %2084 = vmatpush.msra.mxu3 %v1030_v24  ;;  %v1708_v54 = vadd.f32 %v1707_v61, %v1688_v63 }
 0x2a8   :  { %2090 = vmatpush.msra.mxu0 %v1240_v25  ;;  %2126 = vmatmul.f32.vlgmr.msrb.gmra.mxu1 %v3838_v53  ;;  %v1212_v53 = vld [vmem:[%s4941_s7 + $0x998] sm:$0xff]  ;;  %v2164_v25 = vrot.slane %v2151_v20, 6 }
 0x2a9   :  { %2085 = vmatpush.msra.mxu3 %v1023_v27  ;;  %v1728_v10 = vadd.f32 %v1727_v2, %v1708_v54  ;;  %v1807_v15 = vpop.f32.mrf.mxu1 }
 0x2aa   :  { %2091 = vmatpush.msra.mxu0 %v1233_v28  ;;  %2086 = vmatmul.f32.vlgmr.msra.gmra.mxu3 %v3557_v1  ;;  %v1198_v1 = vld [vmem:[%s4941_s7 + $0x928] sm:$0xff]  ;;  %v1827_v19 = vpop.f32.mrf.mxu2  ;;  %s2250_s7 = smov [#allocation2]  }
 0x2ab   :  { %v1748_v43 = vadd.f32 %v1747_v6, %v1728_v10  ;;  %s2189_s23 = sshll.u32 %s2250_s7, 4  ;;  %s2190_s23 = int_to_ptr.vmem [resolvable:$true] %s2189_s23 }
 0x2ac   :  { %2092 = vmatpush.msra.mxu0 %v1226_v31 }
 0x2ad   :  { %v2152_v23 = vmax.f32 %v1748_v43, 0.0 }
 0x2ae   :  { %2093 = vmatpush.msra.mxu0 %v1219_v32 }
 0x2af   :  { %v2165_v29 = vrot.slane %v2152_v23, 4 }
 0x2b0   :  { %2094 = vmatpush.msra.mxu0 %v1212_v53 }
 0x2b1   :  { %v1767_v7 = vpop.f32.mrf.mxu3 }
 0x2b2   :  { %2095 = vmatpush.msra.mxu0 %v1205_v35  ;;  %v1768_v11 = vadd.f32 %v1767_v7, %v1435_v5 }
 0x2b4   :  { %2096 = vmatpush.msra.mxu0 %v1198_v1 }
 0x2b6   :  { %2097 = vmatpush.msra.mxu0 %v1191_v37 }
 0x2b8   :  { %2098 = vmatpush.msra.mxu0 %v1184_v38 }
 0x2ba   :  { %2099 = vmatpush.msra.mxu0 %v1177_v42 }
 0x2bc   :  { %2100 = vmatpush.msra.mxu0 %v1170_v44 }
 0x2be   :  { %2101 = vmatpush.msra.mxu0 %v1163_v49 }
 0x2c0   :  { %2102 = vmatpush.msra.mxu0 %v1156_v55 }
 0x2c2   :  { %2103 = vmatpush.msra.mxu0 %v1149_v59 }
 0x2c4   :  { %2104 = vmatpush.msra.mxu0 %v1142_v56 }
 0x2c6   :  { %2105 = vmatpush.msra.mxu0 %v1135_v0  ;;  %v1907_v35 = vpop.f32.mrf.mxu2 }
 0x2c7   :  { %2106 = vmatmul.f32.vlgmr.msra.gmra.mxu0 %v3667_v48  ;;  %v1548_v48 = vadd.f32 %v4877_v36, %v1528_v26  ;;  %v1437_v36 = vperm.slane %v4900_v50, 5 }
 0x2c8   :  { %v1847_v22 = vpop.f32.mrf.mxu3 }
 0x2c9   :  { %v2150_v28 = vmax.f32 %v1548_v48, 0.0 }
 0x2ca   :  { %v1787_v17 = vpop.f32.mrf.mxu0  ;;  %v1887_v34 = vpop.f32.mrf.mxu1 }
 0x2cb   :  { %v1788_v14 = vadd.f32 %v1787_v17, %v1768_v11  ;;  %v2170_v31 = vsel %vm2169_vm6, %v2150_v28, %v2164_v25 }
 0x2cd   :  { %v1808_v18 = vadd.f32 %v1807_v15, %v1788_v14 }
 0x2cf   :  { %v1828_v21 = vadd.f32 %v1827_v19, %v1808_v18 }
 0x2d1   :  { %v1848_v24 = vadd.f32 %v1847_v22, %v1828_v21 }
 0x2d3   :  { %v2153_v27 = vmax.f32 %v1848_v24, 0.0 }
 0x2d5   :  { %v2166_v30 = vrot.slane %v2153_v27, 2 }
 0x2d7   :  { %v2172_v32 = vsel %vm2171_vm7, %v2165_v29, %v2166_v30 }
 0x2d8   :  { %v2173_v33 = vsel %vm137_vm1, %v2170_v31, %v2172_v32 }
 0x2d9   :  { %2178 = vst [vmem:[#allocation2] sm:$0xff] %v2173_v33 }
 0x2e8   :  { %v1987_v38 = vpop.f32.mrf.mxu2 }
 0x2ea   :  { %v1927_v1 = vpop.f32.mrf.mxu3 }
 0x2ec   :  { %v1867_v53 = vpop.f32.mrf.mxu0  ;;  %v1967_v47 = vpop.f32.mrf.mxu1 }
 0x2ed   :  { %v1968_v41 = vadd.f32 %v1967_v47, %v1437_v36  ;;  %v1868_v44 = vadd.f32 %v1867_v53, %v1436_v39 }
 0x2ef   :  { %v1988_v45 = vadd.f32 %v1987_v38, %v1968_v41  ;;  %v1888_v52 = vadd.f32 %v1887_v34, %v1868_v44 }
 0x2f1   :  { %v1908_v60 = vadd.f32 %v1907_v35, %v1888_v52 }
 0x2f3   :  { %v1928_v0 = vadd.f32 %v1927_v1, %v1908_v60 }
 0x302   :  { %v1947_v37 = vpop.f32.mrf.mxu0 }
 0x303   :  { %v2047_v55 = vpop.f32.mrf.mxu1  ;;  %v1948_v54 = vadd.f32 %v1947_v37, %v1928_v0 }
 0x305   :  { %v2154_v8 = vmax.f32 %v1948_v54, 0.0 }
 0x30b   :  { %v2067_v57 = vpop.f32.mrf.mxu2 }
 0x30c   :  { %v2068_v40 = vadd.f32 %v2067_v57, %v1438_v51 }
 0x30d   :  { %v2007_v42 = vpop.f32.mrf.mxu3 }
 0x30e   :  { %v2008_v49 = vadd.f32 %v2007_v42, %v1988_v45 }
 0x322   :  { %v2147_v5 = vpop.f32.mrf.mxu2 }
 0x324   :  { %v2027_v46 = vpop.f32.mrf.mxu0 }
 0x325   :  { %v2028_v58 = vadd.f32 %v2027_v46, %v2008_v49  ;;  %v2127_v3 = vpop.f32.mrf.mxu1 }
 0x327   :  { %v2048_v56 = vadd.f32 %v2047_v55, %v2028_v58 }
 0x329   :  { %v2155_v2 = vmax.f32 %v2048_v56, 0.0 }
 0x32b   :  { %v2167_v50 = vrot.slane %v2155_v2, 6 }
 0x32d   :  { %v2087_v59 = vpop.f32.mrf.mxu3  ;;  %v2174_v10 = vsel %vm2169_vm6, %v2154_v8, %v2167_v50 }
 0x32e   :  { %v2088_v61 = vadd.f32 %v2087_v59, %v2068_v40 }
 0x344   :  { %v2107_v62 = vpop.f32.mrf.mxu0 }
 0x345   :  { %v2108_v63 = vadd.f32 %v2107_v62, %v2088_v61 }
 0x347   :  { %v2128_v4 = vadd.f32 %v2127_v3, %v2108_v63 }
 0x349   :  { %v2148_v6 = vadd.f32 %v2147_v5, %v2128_v4 }
 0x34b   :  { %v2156_v7 = vmax.f32 %v2148_v6, 0.0 }
 0x34d   :  { %v2168_v9 = vrot.slane %v2156_v7, 4 }
 0x34f   :  { %v2175_v11 = vsel %vm137_vm1, %v2174_v10, %v2168_v9 }
 0x350   :  { %2183 = vst.msk [vmem:[#allocation2 + $0x8] sm:$0x3f] %vm2182_vm11, %v2175_v11 }
 0x351   :  { %2194 = dma.vmem_to_hbm [thread:$0]  %s2190_s23, 224, %s2192_s26, [#allocation3]  }
 0x352   :  { %2248 = dma.done.wait [#allocation3], 224  }
 0x353   :  { %2249 = vsyncadd [#allocation3], 4294967072 }
 0x354   :  { %2199 = vsyncpa [#allocation3], 1 }

</bundles_post_ra>
